<compile_context>
chip_gen: v7x
topology: tpu7x:2x2x1
jax: 0.10.0
libtpu: 0.0.40
codegen_flags: <defaults>
</compile_context>

<pallas_src>
import functools

import jax
import jax.numpy as jnp
from jax import lax
from jax.experimental import pallas as pl
from jax.experimental.pallas import tpu as pltpu


# ----------------------------------------------------------------------------
# fused Pallas kernel: vid2hid + GRU (one batch tile per grid step)
# ----------------------------------------------------------------------------
def _encoder_rnn_kernel(x_ref, wv_ref, bv_ref, wih_ref, bih_ref, whh_ref, bhh_ref,
                        out_ref, hT_ref, *, hidden):
    bB, T, Dv = x_ref.shape
    H = hidden

    # ---- vid2hid:  (bB*T, Dv) @ (Dv, H) + b      (input_dropout: eval = identity)
    x = x_ref[...].reshape(bB * T, Dv)
    xh = jnp.dot(x, wv_ref[...], preferred_element_type=jnp.float32) + bv_ref[...]

    # ---- GRU input-side gates for all timesteps at once (time-parallel matmul)
    gi = jnp.dot(xh, wih_ref[...], preferred_element_type=jnp.float32) + bih_ref[...]
    gi = gi.reshape(bB, T, 3 * H)                       # gate order: [r, z, n]

    whh = whh_ref[...]          # (H, 3H) -- resident across the whole recurrence
    bhh = bhh_ref[...]          # (1, 3H)

    h = jnp.zeros((bB, H), jnp.float32)                 # PyTorch default h0 = 0
    # Sequential recurrence.  T is a compile-time constant, so this fully
    # unrolls with static-slice stores into the output block.
    for t in range(T):
        g_i = gi[:, t, :]                                               # (bB, 3H)
        g_h = jnp.dot(h, whh, preferred_element_type=jnp.float32) + bhh  # (bB, 3H)
        r = jax.nn.sigmoid(g_i[:, 0:H] + g_h[:, 0:H])
        z = jax.nn.sigmoid(g_i[:, H:2 * H] + g_h[:, H:2 * H])
        n = jnp.tanh(g_i[:, 2 * H:3 * H] + r * g_h[:, 2 * H:3 * H])
        h = (1.0 - z) * n + z * h
        out_ref[:, t:t + 1, :] = h[:, None, :]

    hT_ref[...] = h[:, None, :]                         # final hidden state


def _pick_batch_block(B, target=8):
    for cand in range(min(B, target), 0, -1):
        if B % cand == 0:
            return cand
    return B


def encoder_rnn_forward(params, vid_feats, *, batch_block=None):
    """vid_feats: (B, T, dim_vid) f32 -> (output (B, T, H), hidden (1, B, H))."""
    B, T, Dv = vid_feats.shape
    H = params["w_hh"].shape[0]           # weights stored in (K, N) layout

    bB = batch_block if (batch_block and B % batch_block == 0) else _pick_batch_block(B)
    grid = (B // bB,)

    kernel = functools.partial(_encoder_rnn_kernel, hidden=H)
    const2d = lambda i: (0, 0)            # weights resident across grid steps

    out, hT = pl.pallas_call(
        kernel,
        out_shape=(jax.ShapeDtypeStruct((B, T, H), jnp.float32),
                   jax.ShapeDtypeStruct((B, 1, H), jnp.float32)),
        grid=grid,
        in_specs=[
            pl.BlockSpec((bB, T, Dv), lambda i: (i, 0, 0)),   # video features
            pl.BlockSpec((Dv, H), const2d),                   # vid2hid weight (K, N)
            pl.BlockSpec((1, H), const2d),                    # vid2hid bias
            pl.BlockSpec((H, 3 * H), const2d),                # GRU W_ih^T
            pl.BlockSpec((1, 3 * H), const2d),                # GRU b_ih
            pl.BlockSpec((H, 3 * H), const2d),                # GRU W_hh^T
            pl.BlockSpec((1, 3 * H), const2d),                # GRU b_hh
        ],
        out_specs=(pl.BlockSpec((bB, T, H), lambda i: (i, 0, 0)),
                   pl.BlockSpec((bB, 1, H), lambda i: (i, 0, 0))),
        compiler_params=pltpu.CompilerParams(
            dimension_semantics=("parallel",),
            vmem_limit_bytes=64 * 1024 * 1024,
        ),
    )(vid_feats,
      params["w_vid2hid"], params["b_vid2hid"],
      params["w_ih"], params["b_ih"],
      params["w_hh"], params["b_hh"])

    hidden = jnp.transpose(hT, (1, 0, 2))   # (num_layers * num_directions = 1, B, H)
    return out, hidden


# ----------------------------------------------------------------------------
# parameter init (mirrors the torch module: xavier_normal_ on vid2hid.weight,
# U(-1/sqrt(H), 1/sqrt(H)) for GRU params).  Weights stored pre-transposed.
# ----------------------------------------------------------------------------
def build_params(key, dim_vid, dim_hidden):
    k0, k1, k2, k3, k4, k5 = jax.random.split(key, 6)
    H = dim_hidden

    std = float(jnp.sqrt(2.0 / (dim_vid + H)))                    # xavier normal
    w_v = std * jax.random.normal(k0, (H, dim_vid), jnp.float32)  # torch (out, in)
    rb = 1.0 / float(jnp.sqrt(dim_vid))
    b_v = jax.random.uniform(k1, (H,), jnp.float32, -rb, rb)

    rg = 1.0 / float(jnp.sqrt(H))
    w_ih = jax.random.uniform(k2, (3 * H, H), jnp.float32, -rg, rg)  # [r|z|n]
    w_hh = jax.random.uniform(k3, (3 * H, H), jnp.float32, -rg, rg)
    b_ih = jax.random.uniform(k4, (3 * H,), jnp.float32, -rg, rg)
    b_hh = jax.random.uniform(k5, (3 * H,), jnp.float32, -rg, rg)

    return {
        "w_vid2hid": w_v.T,                  # (Dv, H)  -- (K, N) layout for MXU
        "b_vid2hid": b_v.reshape(1, H),
        "w_ih": w_ih.T,                      # (H, 3H)
        "b_ih": b_ih.reshape(1, 3 * H),
        "w_hh": w_hh.T,                      # (H, 3H)
        "b_hh": b_hh.reshape(1, 3 * H),
    }


# ----------------------------------------------------------------------------
# pure-JAX reference (for self-check)
# ----------------------------------------------------------------------------
def encoder_rnn_reference(params, vid_feats):
    B, T, Dv = vid_feats.shape
    H = params["w_hh"].shape[0]
    hp = lax.Precision.HIGHEST

    x = vid_feats.reshape(B * T, Dv)
    xh = jnp.dot(x, params["w_vid2hid"], precision=hp) + params["b_vid2hid"]
    gi_all = jnp.dot(xh, params["w_ih"], precision=hp) + params["b_ih"]
    gi_all = gi_all.reshape(B, T, 3 * H)

    def step(h, gi):
        g_h = jnp.dot(h, params["w_hh"], precision=hp) + params["b_hh"]
        r = jax.nn.sigmoid(gi[:, :H] + g_h[:, :H])
        z = jax.nn.sigmoid(gi[:, H:2 * H] + g_h[:, H:2 * H])
        n = jnp.tanh(gi[:, 2 * H:] + r * g_h[:, 2 * H:])
        h_new = (1.0 - z) * n + z * h
        return h_new, h_new

    h0 = jnp.zeros((B, H), jnp.float32)
    hT, outs = lax.scan(step, h0, jnp.transpose(gi_all, (1, 0, 2)))
    return jnp.transpose(outs, (1, 0, 2)), hT[None]


# ----------------------------------------------------------------------------
if __name__ == "__main__":
    key = jax.random.PRNGKey(0)
    k_x, k_p = jax.random.split(key)

    batch_size = 4
    seq_len = 8
    dim_vid = 64
    dim_hidden = 32

    vid_feats = jax.random.normal(k_x, (batch_size, seq_len, dim_vid), jnp.float32)
    params = build_params(k_p, dim_vid, dim_hidden)

    output, hidden = encoder_rnn_forward(params, vid_feats, batch_block=2)
    output, hidden = jax.block_until_ready((output, hidden))

    assert output.shape == (batch_size, seq_len, dim_hidden)
    assert hidden.shape == (1, batch_size, dim_hidden)
    assert bool(jnp.all(jnp.isfinite(output))) and bool(jnp.all(jnp.isfinite(hidden)))

    ref_out, ref_hid = encoder_rnn_reference(params, vid_feats)
    assert bool(jnp.allclose(output, ref_out, atol=2e-3, rtol=2e-3))
    assert bool(jnp.allclose(hidden, ref_hid, atol=2e-3, rtol=2e-3))

    print("KERNEL_OK")
</pallas_src>

<mosaic_0001>
module attributes {stable_mosaic.version = 11 : i64} {
  func.func @_encoder_rnn_kernel(%arg0: i32, %arg1: memref<2x8x64xf32, #tpu.memory_space<vmem>>, %arg2: memref<64x32xf32, #tpu.memory_space<vmem>>, %arg3: memref<1x32xf32, #tpu.memory_space<vmem>>, %arg4: memref<32x96xf32, #tpu.memory_space<vmem>>, %arg5: memref<1x96xf32, #tpu.memory_space<vmem>>, %arg6: memref<32x96xf32, #tpu.memory_space<vmem>>, %arg7: memref<1x96xf32, #tpu.memory_space<vmem>>, %arg8: memref<2x8x32xf32, #tpu.memory_space<vmem>>, %arg9: memref<2x1x32xf32, #tpu.memory_space<vmem>>) attributes {dimension_semantics = [#tpu.dimension_semantics<parallel>], iteration_bounds = array<i64: 2>, scalar_prefetch = 0 : i64, scratch_operands = 0 : i64, tpu.core_type = #tpu.core_type<tc>, window_params = [{transform_indices = @transform_0, window_bounds = array<i64: 2, 8, 64>}, {pipeline_mode = #tpu.pipeline_mode<synchronous>, transform_indices = @transform_1, window_bounds = array<i64: 64, 32>}, {pipeline_mode = #tpu.pipeline_mode<synchronous>, transform_indices = @transform_2, window_bounds = array<i64: 1, 32>}, {pipeline_mode = #tpu.pipeline_mode<synchronous>, transform_indices = @transform_3, window_bounds = array<i64: 32, 96>}, {pipeline_mode = #tpu.pipeline_mode<synchronous>, transform_indices = @transform_4, window_bounds = array<i64: 1, 96>}, {pipeline_mode = #tpu.pipeline_mode<synchronous>, transform_indices = @transform_5, window_bounds = array<i64: 32, 96>}, {pipeline_mode = #tpu.pipeline_mode<synchronous>, transform_indices = @transform_6, window_bounds = array<i64: 1, 96>}, {transform_indices = @transform_7, window_bounds = array<i64: 2, 8, 32>}, {transform_indices = @transform_8, window_bounds = array<i64: 2, 1, 32>}]} {
    %c0 = arith.constant 0 : index
    %c0_0 = arith.constant 0 : index
    %c0_1 = arith.constant 0 : index
    %0 = vector.load %arg1[%c0, %c0_0, %c0_1] : memref<2x8x64xf32, #tpu.memory_space<vmem>>, vector<2x8x64xf32>
    %1 = vector.shape_cast %0 : vector<2x8x64xf32> to vector<16x64xf32>
    %c0_2 = arith.constant 0 : index
    %c0_3 = arith.constant 0 : index
    %2 = vector.load %arg2[%c0_2, %c0_3] : memref<64x32xf32, #tpu.memory_space<vmem>>, vector<64x32xf32>
    %cst = arith.constant dense<0.000000e+00> : vector<16x32xf32>
    %3 = tpu.matmul %1, %2, %cst {dimension_numbers = #tpu.dot_dimension_numbers<[1], [0], [0], [1], [0, 0, 1, 1], [], []>} : vector<16x64xf32>, vector<64x32xf32>, vector<16x32xf32> -> vector<16x32xf32>
    %c0_4 = arith.constant 0 : index
    %c0_5 = arith.constant 0 : index
    %4 = vector.load %arg3[%c0_4, %c0_5] : memref<1x32xf32, #tpu.memory_space<vmem>>, vector<1x32xf32>
    %5 = vector.broadcast %4 : vector<1x32xf32> to vector<16x32xf32>
    %6 = arith.addf %3, %5 : vector<16x32xf32>
    %c0_6 = arith.constant 0 : index
    %c0_7 = arith.constant 0 : index
    %7 = vector.load %arg4[%c0_6, %c0_7] : memref<32x96xf32, #tpu.memory_space<vmem>>, vector<32x96xf32>
    %cst_8 = arith.constant dense<0.000000e+00> : vector<16x96xf32>
    %8 = tpu.matmul %6, %7, %cst_8 {dimension_numbers = #tpu.dot_dimension_numbers<[1], [0], [0], [1], [0, 0, 1, 1], [], []>} : vector<16x32xf32>, vector<32x96xf32>, vector<16x96xf32> -> vector<16x96xf32>
    %c0_9 = arith.constant 0 : index
    %c0_10 = arith.constant 0 : index
    %9 = vector.load %arg5[%c0_9, %c0_10] : memref<1x96xf32, #tpu.memory_space<vmem>>, vector<1x96xf32>
    %10 = vector.broadcast %9 : vector<1x96xf32> to vector<16x96xf32>
    %11 = arith.addf %8, %10 : vector<16x96xf32>
    %12 = vector.shape_cast %11 : vector<16x96xf32> to vector<2x8x96xf32>
    %c0_11 = arith.constant 0 : index
    %c0_12 = arith.constant 0 : index
    %13 = vector.load %arg6[%c0_11, %c0_12] : memref<32x96xf32, #tpu.memory_space<vmem>>, vector<32x96xf32>
    %c0_13 = arith.constant 0 : index
    %c0_14 = arith.constant 0 : index
    %14 = vector.load %arg7[%c0_13, %c0_14] : memref<1x96xf32, #tpu.memory_space<vmem>>, vector<1x96xf32>
    %cst_15 = arith.constant 0.000000e+00 : f32
    %15 = vector.broadcast %cst_15 : f32 to vector<2x32xf32>
    %16 = vector.extract_strided_slice %12 {offsets = [0, 0, 0], sizes = [2, 1, 96], strides = [1, 1, 1]} : vector<2x8x96xf32> to vector<2x1x96xf32>
    %17 = vector.shape_cast %16 : vector<2x1x96xf32> to vector<2x96xf32>
    %cst_16 = arith.constant dense<0.000000e+00> : vector<2x96xf32>
    %18 = tpu.matmul %15, %13, %cst_16 {dimension_numbers = #tpu.dot_dimension_numbers<[1], [0], [0], [1], [0, 0, 1, 1], [], []>} : vector<2x32xf32>, vector<32x96xf32>, vector<2x96xf32> -> vector<2x96xf32>
    %19 = vector.broadcast %14 : vector<1x96xf32> to vector<2x96xf32>
    %20 = arith.addf %18, %19 : vector<2x96xf32>
    %21 = vector.extract_strided_slice %17 {offsets = [0, 0], sizes = [2, 32], strides = [1, 1]} : vector<2x96xf32> to vector<2x32xf32>
    %22 = vector.extract_strided_slice %20 {offsets = [0, 0], sizes = [2, 32], strides = [1, 1]} : vector<2x96xf32> to vector<2x32xf32>
    %23 = arith.addf %21, %22 : vector<2x32xf32>
    %24 = arith.negf %23 : vector<2x32xf32>
    %25 = math.exp %24 : vector<2x32xf32>
    %cst_17 = arith.constant 1.000000e+00 : f32
    %26 = vector.broadcast %cst_17 : f32 to vector<2x32xf32>
    %27 = arith.addf %26, %25 : vector<2x32xf32>
    %28 = arith.divf %26, %27 : vector<2x32xf32>
    %29 = vector.extract_strided_slice %17 {offsets = [0, 32], sizes = [2, 32], strides = [1, 1]} : vector<2x96xf32> to vector<2x32xf32>
    %30 = vector.extract_strided_slice %20 {offsets = [0, 32], sizes = [2, 32], strides = [1, 1]} : vector<2x96xf32> to vector<2x32xf32>
    %31 = arith.addf %29, %30 : vector<2x32xf32>
    %32 = arith.negf %31 : vector<2x32xf32>
    %33 = math.exp %32 : vector<2x32xf32>
    %cst_18 = arith.constant 1.000000e+00 : f32
    %34 = vector.broadcast %cst_18 : f32 to vector<2x32xf32>
    %35 = arith.addf %34, %33 : vector<2x32xf32>
    %36 = arith.divf %34, %35 : vector<2x32xf32>
    %37 = vector.extract_strided_slice %17 {offsets = [0, 64], sizes = [2, 32], strides = [1, 1]} : vector<2x96xf32> to vector<2x32xf32>
    %38 = vector.extract_strided_slice %20 {offsets = [0, 64], sizes = [2, 32], strides = [1, 1]} : vector<2x96xf32> to vector<2x32xf32>
    %39 = arith.mulf %28, %38 : vector<2x32xf32>
    %40 = arith.addf %37, %39 : vector<2x32xf32>
    %41 = math.tanh %40 : vector<2x32xf32>
    %cst_19 = arith.constant 1.000000e+00 : f32
    %42 = vector.broadcast %cst_19 : f32 to vector<2x32xf32>
    %43 = arith.subf %42, %36 : vector<2x32xf32>
    %44 = arith.mulf %43, %41 : vector<2x32xf32>
    %45 = arith.mulf %36, %15 : vector<2x32xf32>
    %46 = arith.addf %44, %45 : vector<2x32xf32>
    %47 = vector.shape_cast %46 : vector<2x32xf32> to vector<2x1x32xf32>
    %c0_20 = arith.constant 0 : index
    %c0_21 = arith.constant 0 : index
    %c0_22 = arith.constant 0 : index
    %48 = vector.load %arg8[%c0_20, %c0_21, %c0_22] : memref<2x8x32xf32, #tpu.memory_space<vmem>>, vector<2x1x32xf32>
    tpu.vector_store %arg8[%c0_20, %c0_21, %c0_22], %47 {strides = array<i32>} : memref<2x8x32xf32, #tpu.memory_space<vmem>>, vector<2x1x32xf32>,
    %49 = vector.extract_strided_slice %12 {offsets = [0, 1, 0], sizes = [2, 1, 96], strides = [1, 1, 1]} : vector<2x8x96xf32> to vector<2x1x96xf32>
    %50 = vector.shape_cast %49 : vector<2x1x96xf32> to vector<2x96xf32>
    %cst_23 = arith.constant dense<0.000000e+00> : vector<2x96xf32>
    %51 = tpu.matmul %46, %13, %cst_23 {dimension_numbers = #tpu.dot_dimension_numbers<[1], [0], [0], [1], [0, 0, 1, 1], [], []>} : vector<2x32xf32>, vector<32x96xf32>, vector<2x96xf32> -> vector<2x96xf32>
    %52 = vector.broadcast %14 : vector<1x96xf32> to vector<2x96xf32>
    %53 = arith.addf %51, %52 : vector<2x96xf32>
    %54 = vector.extract_strided_slice %50 {offsets = [0, 0], sizes = [2, 32], strides = [1, 1]} : vector<2x96xf32> to vector<2x32xf32>
    %55 = vector.extract_strided_slice %53 {offsets = [0, 0], sizes = [2, 32], strides = [1, 1]} : vector<2x96xf32> to vector<2x32xf32>
    %56 = arith.addf %54, %55 : vector<2x32xf32>
    %57 = arith.negf %56 : vector<2x32xf32>
    %58 = math.exp %57 : vector<2x32xf32>
    %cst_24 = arith.constant 1.000000e+00 : f32
    %59 = vector.broadcast %cst_24 : f32 to vector<2x32xf32>
    %60 = arith.addf %59, %58 : vector<2x32xf32>
    %61 = arith.divf %59, %60 : vector<2x32xf32>
    %62 = vector.extract_strided_slice %50 {offsets = [0, 32], sizes = [2, 32], strides = [1, 1]} : vector<2x96xf32> to vector<2x32xf32>
    %63 = vector.extract_strided_slice %53 {offsets = [0, 32], sizes = [2, 32], strides = [1, 1]} : vector<2x96xf32> to vector<2x32xf32>
    %64 = arith.addf %62, %63 : vector<2x32xf32>
    %65 = arith.negf %64 : vector<2x32xf32>
    %66 = math.exp %65 : vector<2x32xf32>
    %cst_25 = arith.constant 1.000000e+00 : f32
    %67 = vector.broadcast %cst_25 : f32 to vector<2x32xf32>
    %68 = arith.addf %67, %66 : vector<2x32xf32>
    %69 = arith.divf %67, %68 : vector<2x32xf32>
    %70 = vector.extract_strided_slice %50 {offsets = [0, 64], sizes = [2, 32], strides = [1, 1]} : vector<2x96xf32> to vector<2x32xf32>
    %71 = vector.extract_strided_slice %53 {offsets = [0, 64], sizes = [2, 32], strides = [1, 1]} : vector<2x96xf32> to vector<2x32xf32>
    %72 = arith.mulf %61, %71 : vector<2x32xf32>
    %73 = arith.addf %70, %72 : vector<2x32xf32>
    %74 = math.tanh %73 : vector<2x32xf32>
    %cst_26 = arith.constant 1.000000e+00 : f32
    %75 = vector.broadcast %cst_26 : f32 to vector<2x32xf32>
    %76 = arith.subf %75, %69 : vector<2x32xf32>
    %77 = arith.mulf %76, %74 : vector<2x32xf32>
    %78 = arith.mulf %69, %46 : vector<2x32xf32>
    %79 = arith.addf %77, %78 : vector<2x32xf32>
    %80 = vector.shape_cast %79 : vector<2x32xf32> to vector<2x1x32xf32>
    %c0_27 = arith.constant 0 : index
    %c1 = arith.constant 1 : index
    %c0_28 = arith.constant 0 : index
    %81 = vector.load %arg8[%c0_27, %c1, %c0_28] : memref<2x8x32xf32, #tpu.memory_space<vmem>>, vector<2x1x32xf32>
    tpu.vector_store %arg8[%c0_27, %c1, %c0_28], %80 {strides = array<i32>} : memref<2x8x32xf32, #tpu.memory_space<vmem>>, vector<2x1x32xf32>,
    %82 = vector.extract_strided_slice %12 {offsets = [0, 2, 0], sizes = [2, 1, 96], strides = [1, 1, 1]} : vector<2x8x96xf32> to vector<2x1x96xf32>
    %83 = vector.shape_cast %82 : vector<2x1x96xf32> to vector<2x96xf32>
    %cst_29 = arith.constant dense<0.000000e+00> : vector<2x96xf32>
    %84 = tpu.matmul %79, %13, %cst_29 {dimension_numbers = #tpu.dot_dimension_numbers<[1], [0], [0], [1], [0, 0, 1, 1], [], []>} : vector<2x32xf32>, vector<32x96xf32>, vector<2x96xf32> -> vector<2x96xf32>
    %85 = vector.broadcast %14 : vector<1x96xf32> to vector<2x96xf32>
    %86 = arith.addf %84, %85 : vector<2x96xf32>
    %87 = vector.extract_strided_slice %83 {offsets = [0, 0], sizes = [2, 32], strides = [1, 1]} : vector<2x96xf32> to vector<2x32xf32>
    %88 = vector.extract_strided_slice %86 {offsets = [0, 0], sizes = [2, 32], strides = [1, 1]} : vector<2x96xf32> to vector<2x32xf32>
    %89 = arith.addf %87, %88 : vector<2x32xf32>
    %90 = arith.negf %89 : vector<2x32xf32>
    %91 = math.exp %90 : vector<2x32xf32>
    %cst_30 = arith.constant 1.000000e+00 : f32
    %92 = vector.broadcast %cst_30 : f32 to vector<2x32xf32>
    %93 = arith.addf %92, %91 : vector<2x32xf32>
    %94 = arith.divf %92, %93 : vector<2x32xf32>
    %95 = vector.extract_strided_slice %83 {offsets = [0, 32], sizes = [2, 32], strides = [1, 1]} : vector<2x96xf32> to vector<2x32xf32>
    %96 = vector.extract_strided_slice %86 {offsets = [0, 32], sizes = [2, 32], strides = [1, 1]} : vector<2x96xf32> to vector<2x32xf32>
    %97 = arith.addf %95, %96 : vector<2x32xf32>
    %98 = arith.negf %97 : vector<2x32xf32>
    %99 = math.exp %98 : vector<2x32xf32>
    %cst_31 = arith.constant 1.000000e+00 : f32
    %100 = vector.broadcast %cst_31 : f32 to vector<2x32xf32>
    %101 = arith.addf %100, %99 : vector<2x32xf32>
    %102 = arith.divf %100, %101 : vector<2x32xf32>
    %103 = vector.extract_strided_slice %83 {offsets = [0, 64], sizes = [2, 32], strides = [1, 1]} : vector<2x96xf32> to vector<2x32xf32>
    %104 = vector.extract_strided_slice %86 {offsets = [0, 64], sizes = [2, 32], strides = [1, 1]} : vector<2x96xf32> to vector<2x32xf32>
    %105 = arith.mulf %94, %104 : vector<2x32xf32>
    %106 = arith.addf %103, %105 : vector<2x32xf32>
    %107 = math.tanh %106 : vector<2x32xf32>
    %cst_32 = arith.constant 1.000000e+00 : f32
    %108 = vector.broadcast %cst_32 : f32 to vector<2x32xf32>
    %109 = arith.subf %108, %102 : vector<2x32xf32>
    %110 = arith.mulf %109, %107 : vector<2x32xf32>
    %111 = arith.mulf %102, %79 : vector<2x32xf32>
    %112 = arith.addf %110, %111 : vector<2x32xf32>
    %113 = vector.shape_cast %112 : vector<2x32xf32> to vector<2x1x32xf32>
    %c0_33 = arith.constant 0 : index
    %c2 = arith.constant 2 : index
    %c0_34 = arith.constant 0 : index
    %114 = vector.load %arg8[%c0_33, %c2, %c0_34] : memref<2x8x32xf32, #tpu.memory_space<vmem>>, vector<2x1x32xf32>
    tpu.vector_store %arg8[%c0_33, %c2, %c0_34], %113 {strides = array<i32>} : memref<2x8x32xf32, #tpu.memory_space<vmem>>, vector<2x1x32xf32>,
    %115 = vector.extract_strided_slice %12 {offsets = [0, 3, 0], sizes = [2, 1, 96], strides = [1, 1, 1]} : vector<2x8x96xf32> to vector<2x1x96xf32>
    %116 = vector.shape_cast %115 : vector<2x1x96xf32> to vector<2x96xf32>
    %cst_35 = arith.constant dense<0.000000e+00> : vector<2x96xf32>
    %117 = tpu.matmul %112, %13, %cst_35 {dimension_numbers = #tpu.dot_dimension_numbers<[1], [0], [0], [1], [0, 0, 1, 1], [], []>} : vector<2x32xf32>, vector<32x96xf32>, vector<2x96xf32> -> vector<2x96xf32>
    %118 = vector.broadcast %14 : vector<1x96xf32> to vector<2x96xf32>
    %119 = arith.addf %117, %118 : vector<2x96xf32>
    %120 = vector.extract_strided_slice %116 {offsets = [0, 0], sizes = [2, 32], strides = [1, 1]} : vector<2x96xf32> to vector<2x32xf32>
    %121 = vector.extract_strided_slice %119 {offsets = [0, 0], sizes = [2, 32], strides = [1, 1]} : vector<2x96xf32> to vector<2x32xf32>
    %122 = arith.addf %120, %121 : vector<2x32xf32>
    %123 = arith.negf %122 : vector<2x32xf32>
    %124 = math.exp %123 : vector<2x32xf32>
    %cst_36 = arith.constant 1.000000e+00 : f32
    %125 = vector.broadcast %cst_36 : f32 to vector<2x32xf32>
    %126 = arith.addf %125, %124 : vector<2x32xf32>
    %127 = arith.divf %125, %126 : vector<2x32xf32>
    %128 = vector.extract_strided_slice %116 {offsets = [0, 32], sizes = [2, 32], strides = [1, 1]} : vector<2x96xf32> to vector<2x32xf32>
    %129 = vector.extract_strided_slice %119 {offsets = [0, 32], sizes = [2, 32], strides = [1, 1]} : vector<2x96xf32> to vector<2x32xf32>
    %130 = arith.addf %128, %129 : vector<2x32xf32>
    %131 = arith.negf %130 : vector<2x32xf32>
    %132 = math.exp %131 : vector<2x32xf32>
    %cst_37 = arith.constant 1.000000e+00 : f32
    %133 = vector.broadcast %cst_37 : f32 to vector<2x32xf32>
    %134 = arith.addf %133, %132 : vector<2x32xf32>
    %135 = arith.divf %133, %134 : vector<2x32xf32>
    %136 = vector.extract_strided_slice %116 {offsets = [0, 64], sizes = [2, 32], strides = [1, 1]} : vector<2x96xf32> to vector<2x32xf32>
    %137 = vector.extract_strided_slice %119 {offsets = [0, 64], sizes = [2, 32], strides = [1, 1]} : vector<2x96xf32> to vector<2x32xf32>
    %138 = arith.mulf %127, %137 : vector<2x32xf32>
    %139 = arith.addf %136, %138 : vector<2x32xf32>
    %140 = math.tanh %139 : vector<2x32xf32>
    %cst_38 = arith.constant 1.000000e+00 : f32
    %141 = vector.broadcast %cst_38 : f32 to vector<2x32xf32>
    %142 = arith.subf %141, %135 : vector<2x32xf32>
    %143 = arith.mulf %142, %140 : vector<2x32xf32>
    %144 = arith.mulf %135, %112 : vector<2x32xf32>
    %145 = arith.addf %143, %144 : vector<2x32xf32>
    %146 = vector.shape_cast %145 : vector<2x32xf32> to vector<2x1x32xf32>
    %c0_39 = arith.constant 0 : index
    %c3 = arith.constant 3 : index
    %c0_40 = arith.constant 0 : index
    %147 = vector.load %arg8[%c0_39, %c3, %c0_40] : memref<2x8x32xf32, #tpu.memory_space<vmem>>, vector<2x1x32xf32>
    tpu.vector_store %arg8[%c0_39, %c3, %c0_40], %146 {strides = array<i32>} : memref<2x8x32xf32, #tpu.memory_space<vmem>>, vector<2x1x32xf32>,
    %148 = vector.extract_strided_slice %12 {offsets = [0, 4, 0], sizes = [2, 1, 96], strides = [1, 1, 1]} : vector<2x8x96xf32> to vector<2x1x96xf32>
    %149 = vector.shape_cast %148 : vector<2x1x96xf32> to vector<2x96xf32>
    %cst_41 = arith.constant dense<0.000000e+00> : vector<2x96xf32>
    %150 = tpu.matmul %145, %13, %cst_41 {dimension_numbers = #tpu.dot_dimension_numbers<[1], [0], [0], [1], [0, 0, 1, 1], [], []>} : vector<2x32xf32>, vector<32x96xf32>, vector<2x96xf32> -> vector<2x96xf32>
    %151 = vector.broadcast %14 : vector<1x96xf32> to vector<2x96xf32>
    %152 = arith.addf %150, %151 : vector<2x96xf32>
    %153 = vector.extract_strided_slice %149 {offsets = [0, 0], sizes = [2, 32], strides = [1, 1]} : vector<2x96xf32> to vector<2x32xf32>
    %154 = vector.extract_strided_slice %152 {offsets = [0, 0], sizes = [2, 32], strides = [1, 1]} : vector<2x96xf32> to vector<2x32xf32>
    %155 = arith.addf %153, %154 : vector<2x32xf32>
    %156 = arith.negf %155 : vector<2x32xf32>
    %157 = math.exp %156 : vector<2x32xf32>
    %cst_42 = arith.constant 1.000000e+00 : f32
    %158 = vector.broadcast %cst_42 : f32 to vector<2x32xf32>
    %159 = arith.addf %158, %157 : vector<2x32xf32>
    %160 = arith.divf %158, %159 : vector<2x32xf32>
    %161 = vector.extract_strided_slice %149 {offsets = [0, 32], sizes = [2, 32], strides = [1, 1]} : vector<2x96xf32> to vector<2x32xf32>
    %162 = vector.extract_strided_slice %152 {offsets = [0, 32], sizes = [2, 32], strides = [1, 1]} : vector<2x96xf32> to vector<2x32xf32>
    %163 = arith.addf %161, %162 : vector<2x32xf32>
    %164 = arith.negf %163 : vector<2x32xf32>
    %165 = math.exp %164 : vector<2x32xf32>
    %cst_43 = arith.constant 1.000000e+00 : f32
    %166 = vector.broadcast %cst_43 : f32 to vector<2x32xf32>
    %167 = arith.addf %166, %165 : vector<2x32xf32>
    %168 = arith.divf %166, %167 : vector<2x32xf32>
    %169 = vector.extract_strided_slice %149 {offsets = [0, 64], sizes = [2, 32], strides = [1, 1]} : vector<2x96xf32> to vector<2x32xf32>
    %170 = vector.extract_strided_slice %152 {offsets = [0, 64], sizes = [2, 32], strides = [1, 1]} : vector<2x96xf32> to vector<2x32xf32>
    %171 = arith.mulf %160, %170 : vector<2x32xf32>
    %172 = arith.addf %169, %171 : vector<2x32xf32>
    %173 = math.tanh %172 : vector<2x32xf32>
    %cst_44 = arith.constant 1.000000e+00 : f32
    %174 = vector.broadcast %cst_44 : f32 to vector<2x32xf32>
    %175 = arith.subf %174, %168 : vector<2x32xf32>
    %176 = arith.mulf %175, %173 : vector<2x32xf32>
    %177 = arith.mulf %168, %145 : vector<2x32xf32>
    %178 = arith.addf %176, %177 : vector<2x32xf32>
    %179 = vector.shape_cast %178 : vector<2x32xf32> to vector<2x1x32xf32>
    %c0_45 = arith.constant 0 : index
    %c4 = arith.constant 4 : index
    %c0_46 = arith.constant 0 : index
    %180 = vector.load %arg8[%c0_45, %c4, %c0_46] : memref<2x8x32xf32, #tpu.memory_space<vmem>>, vector<2x1x32xf32>
    tpu.vector_store %arg8[%c0_45, %c4, %c0_46], %179 {strides = array<i32>} : memref<2x8x32xf32, #tpu.memory_space<vmem>>, vector<2x1x32xf32>,
    %181 = vector.extract_strided_slice %12 {offsets = [0, 5, 0], sizes = [2, 1, 96], strides = [1, 1, 1]} : vector<2x8x96xf32> to vector<2x1x96xf32>
    %182 = vector.shape_cast %181 : vector<2x1x96xf32> to vector<2x96xf32>
    %cst_47 = arith.constant dense<0.000000e+00> : vector<2x96xf32>
    %183 = tpu.matmul %178, %13, %cst_47 {dimension_numbers = #tpu.dot_dimension_numbers<[1], [0], [0], [1], [0, 0, 1, 1], [], []>} : vector<2x32xf32>, vector<32x96xf32>, vector<2x96xf32> -> vector<2x96xf32>
    %184 = vector.broadcast %14 : vector<1x96xf32> to vector<2x96xf32>
    %185 = arith.addf %183, %184 : vector<2x96xf32>
    %186 = vector.extract_strided_slice %182 {offsets = [0, 0], sizes = [2, 32], strides = [1, 1]} : vector<2x96xf32> to vector<2x32xf32>
    %187 = vector.extract_strided_slice %185 {offsets = [0, 0], sizes = [2, 32], strides = [1, 1]} : vector<2x96xf32> to vector<2x32xf32>
    %188 = arith.addf %186, %187 : vector<2x32xf32>
    %189 = arith.negf %188 : vector<2x32xf32>
    %190 = math.exp %189 : vector<2x32xf32>
    %cst_48 = arith.constant 1.000000e+00 : f32
    %191 = vector.broadcast %cst_48 : f32 to vector<2x32xf32>
    %192 = arith.addf %191, %190 : vector<2x32xf32>
    %193 = arith.divf %191, %192 : vector<2x32xf32>
    %194 = vector.extract_strided_slice %182 {offsets = [0, 32], sizes = [2, 32], strides = [1, 1]} : vector<2x96xf32> to vector<2x32xf32>
    %195 = vector.extract_strided_slice %185 {offsets = [0, 32], sizes = [2, 32], strides = [1, 1]} : vector<2x96xf32> to vector<2x32xf32>
    %196 = arith.addf %194, %195 : vector<2x32xf32>
    %197 = arith.negf %196 : vector<2x32xf32>
    %198 = math.exp %197 : vector<2x32xf32>
    %cst_49 = arith.constant 1.000000e+00 : f32
    %199 = vector.broadcast %cst_49 : f32 to vector<2x32xf32>
    %200 = arith.addf %199, %198 : vector<2x32xf32>
    %201 = arith.divf %199, %200 : vector<2x32xf32>
    %202 = vector.extract_strided_slice %182 {offsets = [0, 64], sizes = [2, 32], strides = [1, 1]} : vector<2x96xf32> to vector<2x32xf32>
    %203 = vector.extract_strided_slice %185 {offsets = [0, 64], sizes = [2, 32], strides = [1, 1]} : vector<2x96xf32> to vector<2x32xf32>
    %204 = arith.mulf %193, %203 : vector<2x32xf32>
    %205 = arith.addf %202, %204 : vector<2x32xf32>
    %206 = math.tanh %205 : vector<2x32xf32>
    %cst_50 = arith.constant 1.000000e+00 : f32
    %207 = vector.broadcast %cst_50 : f32 to vector<2x32xf32>
    %208 = arith.subf %207, %201 : vector<2x32xf32>
    %209 = arith.mulf %208, %206 : vector<2x32xf32>
    %210 = arith.mulf %201, %178 : vector<2x32xf32>
    %211 = arith.addf %209, %210 : vector<2x32xf32>
    %212 = vector.shape_cast %211 : vector<2x32xf32> to vector<2x1x32xf32>
    %c0_51 = arith.constant 0 : index
    %c5 = arith.constant 5 : index
    %c0_52 = arith.constant 0 : index
    %213 = vector.load %arg8[%c0_51, %c5, %c0_52] : memref<2x8x32xf32, #tpu.memory_space<vmem>>, vector<2x1x32xf32>
    tpu.vector_store %arg8[%c0_51, %c5, %c0_52], %212 {strides = array<i32>} : memref<2x8x32xf32, #tpu.memory_space<vmem>>, vector<2x1x32xf32>,
    %214 = vector.extract_strided_slice %12 {offsets = [0, 6, 0], sizes = [2, 1, 96], strides = [1, 1, 1]} : vector<2x8x96xf32> to vector<2x1x96xf32>
    %215 = vector.shape_cast %214 : vector<2x1x96xf32> to vector<2x96xf32>
    %cst_53 = arith.constant dense<0.000000e+00> : vector<2x96xf32>
    %216 = tpu.matmul %211, %13, %cst_53 {dimension_numbers = #tpu.dot_dimension_numbers<[1], [0], [0], [1], [0, 0, 1, 1], [], []>} : vector<2x32xf32>, vector<32x96xf32>, vector<2x96xf32> -> vector<2x96xf32>
    %217 = vector.broadcast %14 : vector<1x96xf32> to vector<2x96xf32>
    %218 = arith.addf %216, %217 : vector<2x96xf32>
    %219 = vector.extract_strided_slice %215 {offsets = [0, 0], sizes = [2, 32], strides = [1, 1]} : vector<2x96xf32> to vector<2x32xf32>
    %220 = vector.extract_strided_slice %218 {offsets = [0, 0], sizes = [2, 32], strides = [1, 1]} : vector<2x96xf32> to vector<2x32xf32>
    %221 = arith.addf %219, %220 : vector<2x32xf32>
    %222 = arith.negf %221 : vector<2x32xf32>
    %223 = math.exp %222 : vector<2x32xf32>
    %cst_54 = arith.constant 1.000000e+00 : f32
    %224 = vector.broadcast %cst_54 : f32 to vector<2x32xf32>
    %225 = arith.addf %224, %223 : vector<2x32xf32>
    %226 = arith.divf %224, %225 : vector<2x32xf32>
    %227 = vector.extract_strided_slice %215 {offsets = [0, 32], sizes = [2, 32], strides = [1, 1]} : vector<2x96xf32> to vector<2x32xf32>
    %228 = vector.extract_strided_slice %218 {offsets = [0, 32], sizes = [2, 32], strides = [1, 1]} : vector<2x96xf32> to vector<2x32xf32>
    %229 = arith.addf %227, %228 : vector<2x32xf32>
    %230 = arith.negf %229 : vector<2x32xf32>
    %231 = math.exp %230 : vector<2x32xf32>
    %cst_55 = arith.constant 1.000000e+00 : f32
    %232 = vector.broadcast %cst_55 : f32 to vector<2x32xf32>
    %233 = arith.addf %232, %231 : vector<2x32xf32>
    %234 = arith.divf %232, %233 : vector<2x32xf32>
    %235 = vector.extract_strided_slice %215 {offsets = [0, 64], sizes = [2, 32], strides = [1, 1]} : vector<2x96xf32> to vector<2x32xf32>
    %236 = vector.extract_strided_slice %218 {offsets = [0, 64], sizes = [2, 32], strides = [1, 1]} : vector<2x96xf32> to vector<2x32xf32>
    %237 = arith.mulf %226, %236 : vector<2x32xf32>
    %238 = arith.addf %235, %237 : vector<2x32xf32>
    %239 = math.tanh %238 : vector<2x32xf32>
    %cst_56 = arith.constant 1.000000e+00 : f32
    %240 = vector.broadcast %cst_56 : f32 to vector<2x32xf32>
    %241 = arith.subf %240, %234 : vector<2x32xf32>
    %242 = arith.mulf %241, %239 : vector<2x32xf32>
    %243 = arith.mulf %234, %211 : vector<2x32xf32>
    %244 = arith.addf %242, %243 : vector<2x32xf32>
    %245 = vector.shape_cast %244 : vector<2x32xf32> to vector<2x1x32xf32>
    %c0_57 = arith.constant 0 : index
    %c6 = arith.constant 6 : index
    %c0_58 = arith.constant 0 : index
    %246 = vector.load %arg8[%c0_57, %c6, %c0_58] : memref<2x8x32xf32, #tpu.memory_space<vmem>>, vector<2x1x32xf32>
    tpu.vector_store %arg8[%c0_57, %c6, %c0_58], %245 {strides = array<i32>} : memref<2x8x32xf32, #tpu.memory_space<vmem>>, vector<2x1x32xf32>,
    %247 = vector.extract_strided_slice %12 {offsets = [0, 7, 0], sizes = [2, 1, 96], strides = [1, 1, 1]} : vector<2x8x96xf32> to vector<2x1x96xf32>
    %248 = vector.shape_cast %247 : vector<2x1x96xf32> to vector<2x96xf32>
    %cst_59 = arith.constant dense<0.000000e+00> : vector<2x96xf32>
    %249 = tpu.matmul %244, %13, %cst_59 {dimension_numbers = #tpu.dot_dimension_numbers<[1], [0], [0], [1], [0, 0, 1, 1], [], []>} : vector<2x32xf32>, vector<32x96xf32>, vector<2x96xf32> -> vector<2x96xf32>
    %250 = vector.broadcast %14 : vector<1x96xf32> to vector<2x96xf32>
    %251 = arith.addf %249, %250 : vector<2x96xf32>
    %252 = vector.extract_strided_slice %248 {offsets = [0, 0], sizes = [2, 32], strides = [1, 1]} : vector<2x96xf32> to vector<2x32xf32>
    %253 = vector.extract_strided_slice %251 {offsets = [0, 0], sizes = [2, 32], strides = [1, 1]} : vector<2x96xf32> to vector<2x32xf32>
    %254 = arith.addf %252, %253 : vector<2x32xf32>
    %255 = arith.negf %254 : vector<2x32xf32>
    %256 = math.exp %255 : vector<2x32xf32>
    %cst_60 = arith.constant 1.000000e+00 : f32
    %257 = vector.broadcast %cst_60 : f32 to vector<2x32xf32>
    %258 = arith.addf %257, %256 : vector<2x32xf32>
    %259 = arith.divf %257, %258 : vector<2x32xf32>
    %260 = vector.extract_strided_slice %248 {offsets = [0, 32], sizes = [2, 32], strides = [1, 1]} : vector<2x96xf32> to vector<2x32xf32>
    %261 = vector.extract_strided_slice %251 {offsets = [0, 32], sizes = [2, 32], strides = [1, 1]} : vector<2x96xf32> to vector<2x32xf32>
    %262 = arith.addf %260, %261 : vector<2x32xf32>
    %263 = arith.negf %262 : vector<2x32xf32>
    %264 = math.exp %263 : vector<2x32xf32>
    %cst_61 = arith.constant 1.000000e+00 : f32
    %265 = vector.broadcast %cst_61 : f32 to vector<2x32xf32>
    %266 = arith.addf %265, %264 : vector<2x32xf32>
    %267 = arith.divf %265, %266 : vector<2x32xf32>
    %268 = vector.extract_strided_slice %248 {offsets = [0, 64], sizes = [2, 32], strides = [1, 1]} : vector<2x96xf32> to vector<2x32xf32>
    %269 = vector.extract_strided_slice %251 {offsets = [0, 64], sizes = [2, 32], strides = [1, 1]} : vector<2x96xf32> to vector<2x32xf32>
    %270 = arith.mulf %259, %269 : vector<2x32xf32>
    %271 = arith.addf %268, %270 : vector<2x32xf32>
    %272 = math.tanh %271 : vector<2x32xf32>
    %cst_62 = arith.constant 1.000000e+00 : f32
    %273 = vector.broadcast %cst_62 : f32 to vector<2x32xf32>
    %274 = arith.subf %273, %267 : vector<2x32xf32>
    %275 = arith.mulf %274, %272 : vector<2x32xf32>
    %276 = arith.mulf %267, %244 : vector<2x32xf32>
    %277 = arith.addf %275, %276 : vector<2x32xf32>
    %278 = vector.shape_cast %277 : vector<2x32xf32> to vector<2x1x32xf32>
    %c0_63 = arith.constant 0 : index
    %c7 = arith.constant 7 : index
    %c0_64 = arith.constant 0 : index
    %279 = vector.load %arg8[%c0_63, %c7, %c0_64] : memref<2x8x32xf32, #tpu.memory_space<vmem>>, vector<2x1x32xf32>
    tpu.vector_store %arg8[%c0_63, %c7, %c0_64], %278 {strides = array<i32>} : memref<2x8x32xf32, #tpu.memory_space<vmem>>, vector<2x1x32xf32>,
    %280 = vector.shape_cast %277 : vector<2x32xf32> to vector<2x1x32xf32>
    %c0_65 = arith.constant 0 : index
    %c0_66 = arith.constant 0 : index
    %c0_67 = arith.constant 0 : index
    %281 = vector.load %arg9[%c0_65, %c0_66, %c0_67] : memref<2x1x32xf32, #tpu.memory_space<vmem>>, vector<2x1x32xf32>
    tpu.vector_store %arg9[%c0_65, %c0_66, %c0_67], %280 {strides = array<i32>} : memref<2x1x32xf32, #tpu.memory_space<vmem>>, vector<2x1x32xf32>,
    return
  }
  func.func @transform_0(%arg0: i32) -> (i32, i32, i32) {
    %c0_i32 = arith.constant 0 : i32
    %c0_i32_0 = arith.constant 0 : i32
    %c0_i32_1 = arith.constant 0 : i32
    return %arg0, %c0_i32, %c0_i32_0 : i32, i32, i32
  }
  func.func @transform_1(%arg0: i32) -> (i32, i32) {
    %c0_i32 = arith.constant 0 : i32
    %c0_i32_0 = arith.constant 0 : i32
    %c0_i32_1 = arith.constant 0 : i32
    return %c0_i32, %c0_i32_0 : i32, i32
  }
  func.func @transform_2(%arg0: i32) -> (i32, i32) {
    %c0_i32 = arith.constant 0 : i32
    %c0_i32_0 = arith.constant 0 : i32
    %c0_i32_1 = arith.constant 0 : i32
    return %c0_i32, %c0_i32_0 : i32, i32
  }
  func.func @transform_3(%arg0: i32) -> (i32, i32) {
    %c0_i32 = arith.constant 0 : i32
    %c0_i32_0 = arith.constant 0 : i32
    %c0_i32_1 = arith.constant 0 : i32
    return %c0_i32, %c0_i32_0 : i32, i32
  }
  func.func @transform_4(%arg0: i32) -> (i32, i32) {
    %c0_i32 = arith.constant 0 : i32
    %c0_i32_0 = arith.constant 0 : i32
    %c0_i32_1 = arith.constant 0 : i32
    return %c0_i32, %c0_i32_0 : i32, i32
  }
  func.func @transform_5(%arg0: i32) -> (i32, i32) {
    %c0_i32 = arith.constant 0 : i32
    %c0_i32_0 = arith.constant 0 : i32
    %c0_i32_1 = arith.constant 0 : i32
    return %c0_i32, %c0_i32_0 : i32, i32
  }
  func.func @transform_6(%arg0: i32) -> (i32, i32) {
    %c0_i32 = arith.constant 0 : i32
    %c0_i32_0 = arith.constant 0 : i32
    %c0_i32_1 = arith.constant 0 : i32
    return %c0_i32, %c0_i32_0 : i32, i32
  }
  func.func @transform_7(%arg0: i32) -> (i32, i32, i32) {
    %c0_i32 = arith.constant 0 : i32
    %c0_i32_0 = arith.constant 0 : i32
    %c0_i32_1 = arith.constant 0 : i32
    return %arg0, %c0_i32, %c0_i32_0 : i32, i32, i32
  }
  func.func @transform_8(%arg0: i32) -> (i32, i32, i32) {
    %c0_i32 = arith.constant 0 : i32
    %c0_i32_0 = arith.constant 0 : i32
    %c0_i32_1 = arith.constant 0 : i32
    return %arg0, %c0_i32, %c0_i32_0 : i32, i32, i32
  }
}

</mosaic_0001>

<bundles_post_ra>
// kernel: tpu_custom_call.1
= control target key start
LH: loop header
LB: loop body
LE: loop exit
PB: predicated region body
PF: predicated region fallthrough
CT: control target
= control target key end

     0   :  { %s3542_s0 = inlined_call_operand.hbm [shape: f32[4,8,64], index: 0, kind: input, shape index: {}]   ;;  %s3543_s1 = inlined_call_operand.hbm [shape: f32[64,32], index: 1, kind: input, shape index: {}]   ;;  %s3544_s2 = inlined_call_operand.hbm [shape: f32[1,32], index: 2, kind: input, shape index: {}]   ;;  %s3545_s3 = inlined_call_operand.hbm [shape: f32[32,96], index: 3, kind: input, shape index: {}]   ;;  %s3546_s4 = inlined_call_operand.hbm [shape: f32[1,96], index: 4, kind: input, shape index: {}]   ;;  %s3547_s5 = inlined_call_operand.hbm [shape: f32[32,96], index: 5, kind: input, shape index: {}]   ;;  %s3548_s6 = inlined_call_operand.hbm [shape: f32[1,96], index: 6, kind: input, shape index: {}]   ;;  %s3549_s7 = inlined_call_operand.hbm [shape: f32[4,8,32], index: 7, kind: output, shape index: {0}]   ;;  %s3550_s8 = inlined_call_operand.hbm [shape: f32[4,1,32], index: 8, kind: output, shape index: {1}]  }
   0x1   :  { %3555 = sst [smem:[#allocation23_spill]] %s3543_s1 }
   0x2   :  { %14 = vsyncpa [#allocation3], 0 }
   0x3   :  { %16 = vsyncpa [#allocation3 + $0x1], 0 }
   0x4   :  { %17 = vsyncpa [#allocation6], 0 }
   0x5   :  { %18 = vsyncpa [#allocation9], 0 }
   0x6   :  { %19 = vsyncpa [#allocation12], 0 }
   0x7   :  { %20 = vsyncpa [#allocation4], 0 }
   0x8   :  { %22 = vsyncpa [#allocation4 + $0x1], 0 }
   0x9   :  { %23 = vsyncpa [#allocation16], 0 }
   0xa   :  { %25 = vsyncpa [#allocation16 + $0x1], 0  ;;  %s2888_s27 = smov 0   ;;  %s2890_s28 = smov 0  }
   0xb   :  { %s2892_s29 = smov 0   ;;  %s2894_s30 = smov 0  }
   0xc LB: > { %s2823_s9 = smov [#allocation5]   ;;  %s2909_s11 = sadd.s32 4294967295, %s2821_s30   ;;  %s2821_s30 = sphi %s2894_s30, %s3580_s30   ;;  %s2817_s29 = sphi %s2892_s29, %s3579_s29   ;;  %s2813_s28 = sphi %s2890_s28, %s3578_s28   ;;  %s2809_s27 = sphi %s2888_s27, %s3577_s27  }
   0xd   : > { %s252_s10 = sshll.u32 %s2823_s9, 4  ;;  %p1986_p0 = scmp.ge.s32.totalorder %s2821_s30, 1  ;;  %s2914_s10 = int_to_ptr.vmem [resolvable:$true] %s252_s10 }
   0xe   : > { %p3551_p1 = scmp.eq.s32.totalorder %s2909_s11, 0  ;;  %p240_p2 = scmp.lt.s32.totalorder %s2821_s30, 3 }
   0xf   : > { %s2824_s13 = smov [#allocation8]   ;;  %s2825_s16 = smov [#allocation11]  }
  0x10   : > { %p2916_p3 = pnand %p1986_p0, %p240_p2  ;;  %s276_s14 = sshll.u32 %s2824_s13, 4  ;;  %s2929_s14 = int_to_ptr.vmem [resolvable:$true] %s276_s14 }
  0x11   : > { %s300_s17 = sshll.u32 %s2825_s16, 4  ;;  %s3558_s1 = sld [smem:[#allocation23_spill]]  ;;  %s2931_s17 = int_to_ptr.vmem [resolvable:$true] %s300_s17 }
  0x12   : > { %s3556_s12 = scalar_select %p2916_p3, 1, 0 }
  0x13   : > { %p2324_p5 = pneg %p2916_p3 }
  0x15   : > { %p2925_p6 = pnand %p2324_p5, %p3551_p1 }
  0x17   : > { %s2513_s20 = scalar_lea.hbm %s3558_s1, 1024  ;;  %p2941_p8 = pneg %p2925_p6 }
  0x18   : > { %p2514_p7 = scmp.ne.s32.totalorder %s3558_s1, %s2513_s20  ;;  %p2520_p11 = scmp.lt.u32.totalorder %s2513_s20, %s3558_s1 }
  0x1a   : > { %p2516_p9 = pnand %p2941_p8, %p2514_p7 }
  0x1c   : > { %p2517_p10 = pneg %p2516_p9 }
  0x1e   : > { %p2522_p12 = pnand %p2520_p11, %p2517_p10 }
  0x20   : > { %2525 = shalt.err (!%p2522_p12)
}
  0x21   : > { %s2526_s26 = scalar_lea.vmem %s2914_s10, 1024  ;;  %p2534_p5 = scmp.lt.s32.totalorder %s2914_s10, %s2914_s10 }
  0x22   : > { %p2527_p13 = scmp.ne.s32.totalorder %s2914_s10, %s2526_s26  ;;  %p2535_p4 = scmp.lt.s32.totalorder %s2526_s26, %s2526_s26 }
  0x24   : > { %p2529_p0 = pnand %p2527_p13, %p2941_p8  ;;  %p2536_p7 = por %p2535_p4, %p2534_p5 }
  0x26   : > { %p2530_p2 = pneg %p2529_p0 }
  0x28   : > { %p2537_p9 = pnand %p2536_p7, %p2530_p2 }
  0x2a   : > { %2540 = shalt.err (!%p2537_p9)
}
  0x2b   : > { %s3553_s9 = smov 128   ;;  %s2827_s13 = smov 8  }
  0x2c   : > { %2327 = dma.hbm_to_vmem [thread:$0]  (!%p2925_p6), %s3558_s1, 1024, %s2914_s10, [#allocation6], %s3553_s9, %s3553_s9, %s2827_s13  }
  0x2d   : > { %s2541_s21 = scalar_lea.hbm %s3545_s3, 512 }
  0x2e   : > { %p2542_p4 = scmp.ne.s32.totalorder %s3545_s3, %s2541_s21  ;;  %p2548_p12 = scmp.lt.u32.totalorder %s2541_s21, %s3545_s3 }
  0x30   : > { %p2544_p10 = pnand %p2542_p4, %p2941_p8 }
  0x32   : > { %p2545_p11 = pneg %p2544_p10 }
  0x34   : > { %p2550_p13 = pnand %p2548_p12, %p2545_p11 }
  0x36   : > { %2553 = shalt.err (!%p2550_p13)
}
  0x37   : > { %s2554_s10 = scalar_lea.vmem %s2929_s14, 512  ;;  %p2562_p7 = scmp.lt.s32.totalorder %s2929_s14, %s2929_s14 }
  0x38   : > { %p2555_p0 = scmp.ne.s32.totalorder %s2929_s14, %s2554_s10  ;;  %p2563_p9 = scmp.lt.s32.totalorder %s2554_s10, %s2554_s10 }
  0x3a   : > { %p2557_p2 = pnand %p2555_p0, %p2941_p8  ;;  %p2564_p4 = por %p2563_p9, %p2562_p7 }
  0x3c   : > { %p2558_p5 = pneg %p2557_p2 }
  0x3e   : > { %p2565_p10 = pnand %p2564_p4, %p2558_p5 }
  0x40   : > { %2568 = shalt.err (!%p2565_p10)
}
  0x41   : > { %2333 = dma.hbm_to_vmem [thread:$0]  (!%p2925_p6), %s3545_s3, 512, %s2929_s14, [#allocation9], %s3553_s9, %s3553_s9, %s2827_s13  }
  0x42   : > { %s2569_s21 = scalar_lea.hbm %s3547_s5, 512 }
  0x43   : > { %p2570_p11 = scmp.ne.s32.totalorder %s3547_s5, %s2569_s21  ;;  %p2576_p0 = scmp.lt.u32.totalorder %s2569_s21, %s3547_s5 }
  0x45   : > { %p2572_p12 = pnand %p2570_p11, %p2941_p8 }
  0x47   : > { %p2573_p13 = pneg %p2572_p12 }
  0x49   : > { %p2578_p2 = pnand %p2576_p0, %p2573_p13 }
  0x4b   : > { %2581 = shalt.err (!%p2578_p2)
}
  0x4c   : > { %s2582_s14 = scalar_lea.vmem %s2931_s17, 512  ;;  %p2590_p4 = scmp.lt.s32.totalorder %s2931_s17, %s2931_s17 }
  0x4d   : > { %p2583_p5 = scmp.ne.s32.totalorder %s2931_s17, %s2582_s14  ;;  %p2591_p10 = scmp.lt.s32.totalorder %s2582_s14, %s2582_s14 }
  0x4f   : > { %p2585_p7 = pnand %p2583_p5, %p2941_p8  ;;  %p2592_p11 = por %p2591_p10, %p2590_p4 }
  0x51   : > { %p2586_p9 = pneg %p2585_p7 }
  0x53   : > { %p2593_p12 = pnand %p2592_p11, %p2586_p9 }
  0x55   : > { %2596 = shalt.err (!%p2593_p12)
}
  0x56   : > { %2339 = dma.hbm_to_vmem [thread:$0]  (!%p2925_p6), %s3547_s5, 512, %s2931_s17, [#allocation12], %s3553_s9, %s3553_s9, %s2827_s13  }
  0x57   : > { %s2828_s18 = smov [#allocation7]   ;;  %s2829_s20 = smov [#allocation10]  }
  0x58   : > { %s266_s19 = sshll.u32 %s2828_s18, 4  ;;  %s290_s21 = sshll.u32 %s2829_s20, 4  ;;  %s267_s19 = int_to_ptr.vmem [resolvable:$true] %s266_s19  ;;  %s291_s21 = int_to_ptr.vmem [resolvable:$true] %s290_s21 }
  0x59   : > { %s2597_s25 = scalar_lea.hbm %s3544_s2, 16 }
  0x5a   : > { %p2598_p13 = scmp.ne.s32.totalorder %s3544_s2, %s2597_s25  ;;  %p2604_p5 = scmp.lt.u32.totalorder %s2597_s25, %s3544_s2 }
  0x5c   : > { %p2600_p0 = pnand %p2598_p13, %p2941_p8 }
  0x5e   : > { %p2601_p2 = pneg %p2600_p0 }
  0x60   : > { %p2606_p7 = pnand %p2604_p5, %p2601_p2 }
  0x62   : > { %2609 = shalt.err (!%p2606_p7)
}
  0x63   : > { %s2610_s17 = scalar_lea.vmem %s267_s19, 16  ;;  %s2617_s16 = scalar_lea.vmem %s267_s19, 32 }
  0x64   : > { %p2611_p9 = scmp.ne.s32.totalorder %s267_s19, %s2610_s17  ;;  %p2618_p11 = scmp.lt.s32.totalorder %s267_s19, %s267_s19 }
  0x65   : > { %p2619_p12 = scmp.lt.s32.totalorder %s2617_s16, %s2610_s17 }
  0x66   : > { %p2613_p4 = pnand %p2611_p9, %p2941_p8 }
  0x67   : > { %p2620_p1 = por %p2619_p12, %p2618_p11 }
  0x68   : > { %p2614_p10 = pneg %p2613_p4 }
  0x6a   : > { %p2621_p3 = pnand %p2620_p1, %p2614_p10 }
  0x6c   : > { %2624 = shalt.err (!%p2621_p3)
}
  0x6d   : > { %2330 = dma.hbm_to_vmem [thread:$0]  (!%p2925_p6), %s3544_s2, 16, %s267_s19, [#allocation6]  }
  0x6e   : > { %s2625_s24 = scalar_lea.hbm %s3546_s4, 16 }
  0x6f   : > { %p2626_p13 = scmp.ne.s32.totalorder %s3546_s4, %s2625_s24  ;;  %p2632_p3 = scmp.lt.u32.totalorder %s2625_s24, %s3546_s4 }
  0x71   : > { %p2628_p0 = pnand %p2626_p13, %p2941_p8 }
  0x73   : > { %p2629_p1 = pneg %p2628_p0 }
  0x75   : > { %p2634_p2 = pnand %p2632_p3, %p2629_p1 }
  0x77   : > { %2637 = shalt.err (!%p2634_p2)
}
  0x78   : > { %s2638_s17 = scalar_lea.vmem %s291_s21, 16  ;;  %s2645_s19 = scalar_lea.vmem %s291_s21, 32 }
  0x79   : > { %p2639_p5 = scmp.ne.s32.totalorder %s291_s21, %s2638_s17  ;;  %p2646_p4 = scmp.lt.s32.totalorder %s291_s21, %s291_s21 }
  0x7a   : > { %p2647_p10 = scmp.lt.s32.totalorder %s2645_s19, %s2638_s17 }
  0x7b   : > { %p2641_p7 = pnand %p2639_p5, %p2941_p8 }
  0x7c   : > { %p2648_p11 = por %p2647_p10, %p2646_p4 }
  0x7d   : > { %p2642_p9 = pneg %p2641_p7 }
  0x7f   : > { %p2649_p12 = pnand %p2648_p11, %p2642_p9 }
  0x81   : > { %2652 = shalt.err (!%p2649_p12)
}
  0x82   : > { %2336 = dma.hbm_to_vmem [thread:$0]  (!%p2925_p6), %s3546_s4, 16, %s291_s21, [#allocation9]  }
  0x83   : > { %s2830_s20 = smov [#allocation13]   ;;  %s2653_s25 = scalar_lea.hbm %s3548_s6, 16 }
  0x84   : > { %s314_s1 = sshll.u32 %s2830_s20, 4  ;;  %p2654_p13 = scmp.ne.s32.totalorder %s3548_s6, %s2653_s25  ;;  %s315_s1 = int_to_ptr.vmem [resolvable:$true] %s314_s1 }
  0x85   : > { %p2660_p3 = scmp.lt.u32.totalorder %s2653_s25, %s3548_s6 }
  0x86   : > { %p2656_p0 = pnand %p2654_p13, %p2941_p8 }
  0x88   : > { %p2657_p1 = pneg %p2656_p0 }
  0x8a   : > { %p2662_p2 = pnand %p2660_p3, %p2657_p1 }
  0x8c   : > { %2665 = shalt.err (!%p2662_p2)
}
  0x8d   : > { %s2666_s21 = scalar_lea.vmem %s315_s1, 16  ;;  %s2673_s19 = scalar_lea.vmem %s315_s1, 32 }
  0x8e   : > { %p2667_p5 = scmp.ne.s32.totalorder %s315_s1, %s2666_s21  ;;  %p2674_p4 = scmp.lt.s32.totalorder %s315_s1, %s315_s1 }
  0x8f   : > { %p2675_p10 = scmp.lt.s32.totalorder %s2673_s19, %s2666_s21 }
  0x90   : > { %p2669_p7 = pnand %p2667_p5, %p2941_p8 }
  0x91   : > { %p2676_p11 = por %p2675_p10, %p2674_p4 }
  0x92   : > { %p2670_p9 = pneg %p2669_p7 }
  0x94   : > { %p2677_p12 = pnand %p2676_p11, %p2670_p9 }
  0x96   : > { %2680 = shalt.err (!%p2677_p12)
}
  0x97   : > { %2342 = dma.hbm_to_vmem [thread:$0]  (!%p2925_p6), %s3548_s6, 16, %s315_s1, [#allocation12]  }
  0x98   : > { %s1985_s23 = sadd.s32 4294967294, %s2821_s30   ;;  %s3073_s15 = sadd.s32 1, %s2821_s30  }
  0x99   : > { %s35_s20 = ssub.s32 %s2821_s30, %s3073_s15  ;;  %s38_s22 = sadd.s32 1, %s2817_s29 }
  0x9a   : > { %p36_p8 = scmp.eq.s32.totalorder %s35_s20, 0  ;;  %p45_p13 = scmp.ne.s32.totalorder %s2817_s29, %s2813_s28 }
  0x9b   : > { %p46_p0 = scmp.eq.s32.totalorder %s2821_s30, 0  ;;  %p51_p1 = scmp.ne.s32.totalorder %s2813_s28, %s2809_s27 }
  0x9c   : > { %s3084_s24 = scalar_select %p36_p8, %s2817_s29, %s38_s22  }
  0x9d   : > { %p3086_p3 = por %p46_p0, %p45_p13  ;;  %p3561_p2 = scmp.eq.s32.totalorder %s2909_s11, 0 }
  0x9e   : > { %p201_p5 = scmp.eq.s32.totalorder %s2909_s11, 1  ;;  %p207_p7 = scmp.eq.s32.totalorder %s1985_s23, 1 }
  0x9f   : > { %p3092_p6 = por %p3561_p2, %p51_p1  ;;  %p2360_p9 = scmp.lt.s32.totalorder %s2821_s30, 2 }
  0xa0   : > { %s325_s26 = sand.u32 1, %s2817_s29   ;;  %p3099_p4 = por %p201_p5, %p45_p13 }
  0xa1   : > { %p3103_p10 = por %p207_p7, %p51_p1  ;;  %s1994_s17 = sshll.u32 %s325_s26, 4 }
  0xa2   : > { %s3563_s14 = scalar_select %p3099_p4, 1, 0 }
  0xa3   : > { %s3564_s10 = scalar_select %p3103_p10, 1, 0 }
  0xa4   : > { %s2045_s21 = sshll.u32 %s2821_s30, 8  ;;  %s329_s23 = scalar_lea.vmem [#allocation2], %s1994_s17 }
  0xa5   : > { %s3111_s18 = scalar_lea.hbm %s3542_s0, %s2045_s21  ;;  %s336_s20 = sshll.u32 %s329_s23, 4  ;;  %s3113_s20 = int_to_ptr.vmem [resolvable:$true] %s336_s20 }
  0xa6   : > { %p3117_p11 = pnand %p2360_p9, %p3086_p3  ;;  %s3121_s9 = scalar_lea.sflag [#allocation3], %s325_s26 }
  0xa7   : > { %s2681_s19 = scalar_lea.hbm %s3111_s18, 256  ;;  %s2686_s25 = scalar_lea.hbm %s3542_s0, 512 }
  0xa8   : > { %p2682_p12 = scmp.ne.s32.totalorder %s3111_s18, %s2681_s19  ;;  %p2683_p8 = pneg %p3117_p11 }
  0xa9   : > { %p2687_p1 = scmp.lt.u32.totalorder %s3111_s18, %s3542_s0  ;;  %p2688_p3 = scmp.lt.u32.totalorder %s2686_s25, %s2681_s19 }
  0xaa   : > { %p2684_p13 = pnand %p2683_p8, %p2682_p12  ;;  %p2690_p5 = scmp.lt.u32.totalorder %s2681_s19, %s3111_s18 }
  0xab   : > { %p2689_p2 = por %p2688_p3, %p2687_p1 }
  0xac   : > { %p2685_p0 = pneg %p2684_p13 }
  0xad   : > { %p2691_p7 = por %p2690_p5, %p2689_p2 }
  0xaf   : > { %p2692_p9 = pnand %p2691_p7, %p2685_p0 }
  0xb1   : > { %2695 = shalt.err (!%p2692_p9)
}
  0xb2   : > { %s2696_s26 = scalar_lea.vmem %s3113_s20, 256  ;;  %s2831_s17 = smov [#allocation2]  }
  0xb3   : > { %p2697_p12 = scmp.ne.s32.totalorder %s3113_s20, %s2696_s26  ;;  %s2701_s21 = sshll.u32 %s2831_s17, 4  ;;  %s2702_s21 = int_to_ptr.vmem [resolvable:$false] %s2701_s21 }
  0xb4   : > { %s2703_s16 = scalar_lea.vmem %s2702_s21, 512  ;;  %p2704_p4 = scmp.lt.s32.totalorder %s3113_s20, %s2702_s21 }
  0xb5   : > { %p2699_p13 = pnand %p2697_p12, %p2683_p8  ;;  %p2705_p1 = scmp.lt.s32.totalorder %s2703_s16, %s2696_s26 }
  0xb7   : > { %p2700_p10 = pneg %p2699_p13  ;;  %p2706_p3 = por %p2705_p1, %p2704_p4 }
  0xb9   : > { %p2707_p2 = pnand %p2706_p3, %p2700_p10 }
  0xbb   : > { %2710 = shalt.err (!%p2707_p2)
}
  0xbc   : > { %s3566_s19 = smov 128   ;;  %p3567_p8 = scmp.ne.s32.totalorder %s3556_s12, 0 }
  0xbd   : > { %2346 = dma.hbm_to_vmem [thread:$0]  (!%p3117_p11), %s3111_s18, 256, %s3113_s20, %s3121_s9, %s3566_s19, %s3566_s19, %s2827_s13  }
  0xbe   : > { %348 = sbr.rel (%p3567_p8) target bundleno = 6079 (0x17bf), region = 48  ;;  %s3155_s25 = sand.u32 (!%p3567_p8), 1, %s2813_s28  }
  0xbf   : > { %s1998_s23 = sshll.u32 (!%p3567_p8), %s3155_s25, 4  ;;  %s351_s26 = scalar_lea.sflag (!%p3567_p8), [#allocation3], %s3155_s25 }
  0xc0   : > { %s3161_s22 = scalar_lea.vmem (!%p3567_p8), [#allocation2], %s1998_s23 }
  0xc5   : > { %2784 = dma.done.wait (%p3092_p6), %s351_s26, 256  }
  0xc6   : > { %2786 = vsyncadd (%p3092_p6), %s351_s26, 4294967040  ;;  %p3568_p4 = scmp.eq.s32.totalorder %s2909_s11, 0 }
  0xc8   : > { %2788 = dma.done.wait (%p3568_p4), [#allocation6], 1040   ;;  %p3569_p10 = pmov %p3568_p4 }
  0xc9   : > { %p3570_p11 = pmov %p3568_p4 }
  0xca   : > { %2790 = vsyncadd (%p3569_p10), [#allocation6], 4294966256 }
  0xcb   : > { %2792 = dma.done.wait (%p3570_p11), [#allocation9], 528   ;;  %p3571_p0 = pmov %p3568_p4 }
  0xcd   : > { %2794 = vsyncadd (%p3571_p0), [#allocation9], 4294966768  ;;  %p3572_p5 = pmov %p3571_p0 }
  0xce   : > { %p3573_p7 = pmov %p3571_p0 }
  0xcf   : > { %2796 = dma.done.wait (%p3572_p5), [#allocation12], 528  }
  0xd0   : > { %2798 = vsyncadd (%p3573_p7), [#allocation12], 4294966768  ;;  %v421_v0 = vld [vmem:[#allocation5] sm:$0xff]  ;;  %v422_v1 = vld [vmem:[#allocation5 + $0x8] sm:$0xff]  ;;  %vm436_vm0 = vcmask 523264   ;;  %v2832_v23 = vmov 0.0|0.0  }
  0xd1   : > { %v423_v2 = vld [vmem:[#allocation5 + $0x10] sm:$0xff]  ;;  %v2222_v3 = vpack.c.bf16 %v422_v1, %v421_v0  ;;  %v424_v4 = vld [vmem:[#allocation5 + $0x18] sm:$0xff]  ;;  %v425_v6 = vld [vmem:[#allocation5 + $0x20] sm:$0xff]  ;;  %vm2833_vm1 = vmmov 0   ;;  %v2834_v27 = vmov 0.0   ;;  %vm529_vm2 = vcmask 261120  }
  0xd2   : > { %v2226_v5 = vpack.c.bf16 %v424_v4, %v423_v2  ;;  %v426_v7 = vld [vmem:[#allocation5 + $0x28] sm:$0xff]  ;;  %v419_v8 = vld [vmem:[%s3161_s22] sm:$0xff]  ;;  %v428_v14 = vld [vmem:[#allocation5 + $0x38] sm:$0xff]  ;;  %s2835_s12 = smov 64   ;;  %s2836_s9 = smov 96   ;;  %vm761_vm3 = vcmask 1041409  }
  0xd3   : > { %2223 = vmatprep.subr.bf16.mxu0 %v2222_v3  ;;  %2120 = vmatprep.mubr.msk.f32.mxu0 %vm436_vm0, %v419_v8  ;;  %v518_v9 = vld [vmem:[#allocation8] sm:$0xff]  ;;  %v519_v10 = vld [vmem:[#allocation8 + $0x8] sm:$0xff]  ;;  %v2230_v12 = vpack.c.bf16 %v426_v7, %v425_v6  ;;  %v520_v17 = vld [vmem:[#allocation8 + $0x10] sm:$0xff]  ;;  %vm757_vm4 = vcmask 253952   ;;  %s3438_s13 = scalar_lea.vmem [#allocation14], %s1998_s23  ;;  %vm902_vm5 = vcmask 254977  }
  0xd4   : > { %2225 = vmatpush3.bf16.msra.mxu0 %v2222_v3  ;;  %v2238_v11 = vpack.c.bf16 %v519_v10, %v518_v9  ;;  %v427_v13 = vld [vmem:[#allocation5 + $0x30] sm:$0xff]  ;;  %v420_v16 = vld [vmem:[%s3161_s22 + $0x8] sm:$0xff]  ;;  %v2007_v28 = vld [vmem:[#allocation7] ss:$0 sm:$0xff]  ;;  %vm1048_vm6 = vcmask 256002   ;;  %vm1195_vm7 = vcmask 257027  }
  0xd5   : > { %2227 = vmatprep.subr.bf16.mxu0 %v2226_v5  ;;  %v2234_v15 = vpack.c.bf16 %v428_v14, %v427_v13  ;;  %v521_v18 = vld [vmem:[#allocation8 + $0x18] sm:$0xff]  ;;  %v611_v20 = vld [vmem:[#allocation11] sm:$0xff]  ;;  %v612_v21 = vld [vmem:[#allocation11 + $0x8] sm:$0xff]  ;;  %vm1342_vm8 = vcmask 258052   ;;  %vm1489_vm9 = vcmask 259077   ;;  %vm1636_vm10 = vcmask 260102  }
  0xd6   : > { %2239 = vmatprep.subr.bf16.mxu1 %v2238_v11  ;;  %v2242_v19 = vpack.c.bf16 %v521_v18, %v520_v17  ;;  %v3183_v22 = vpack.c.bf16 %v612_v21, %v611_v20  ;;  %v613_v24 = vld [vmem:[#allocation11 + $0x10] sm:$0xff]  ;;  %v614_v25 = vld [vmem:[#allocation11 + $0x18] sm:$0xff]  ;;  %v3210_v35 = vld [vmem:[#allocation13] ss:$0 sm:$0xff]  ;;  %s2006_s1 = sshll.u32 %s3155_s25, 1  ;;  %s2046_s17 = sshll.u32 %s2909_s11, 8 }
  0xd7   : > { %2241 = vmatpush3.bf16.msra.mxu1 %v2238_v11  ;;  %v3189_v26 = vpack.c.bf16 %v614_v25, %v613_v24  ;;  %v2010_v40 = vld [vmem:[#allocation10] ss:$0 sm:$0xff]  ;;  %s415_s18 = scalar_lea.vmem [#allocation15], %s2006_s1  ;;  %s1807_s21 = sshll.u32 %s3438_s13, 4  ;;  %vm1783_vm11 = vcmask 261127   ;;  %s3466_s21 = int_to_ptr.vmem [resolvable:$true] %s1807_s21 }
  0xd8   : > { %2229 = vmatpush3.bf16.msra.mxu0 %v2226_v5  ;;  %2243 = vmatprep.subr.bf16.mxu1 %v2242_v19  ;;  %s1823_s20 = sshll.u32 %s415_s18, 4  ;;  %s3464_s23 = scalar_lea.hbm %s3549_s7, %s2046_s17  ;;  %s3459_s20 = int_to_ptr.vmem [resolvable:$true] %s1823_s20 }
  0xd9   : > { %2231 = vmatprep.subr.bf16.mxu0 %v2230_v12  ;;  %s2047_s26 = sshll.u32 %s2909_s11, 5  ;;  %s1789_s1 = scalar_lea.sflag [#allocation4], %s3155_s25 }
  0xda   : > { %s2711_s17 = scalar_lea.vmem %s3466_s21, 256  ;;  %p3574_p9 = scmp.ne.s32.totalorder %s3563_s14, 0 }
  0xdb   : > { %2245 = vmatpush3.bf16.msra.mxu1 %v2242_v19  ;;  %p2712_p6 = scmp.ne.s32.totalorder %s3466_s21, %s2711_s17  ;;  %s2837_s16 = smov [#allocation14]  }
  0xdc   : > { %2233 = vmatpush3.bf16.msra.mxu0 %v2230_v12  ;;  %2246 = vmatprep.subr.bf16.mxu1 %v2832_v23  ;;  %s2715_s11 = sshll.u32 %s2837_s16, 4  ;;  %s2716_s11 = int_to_ptr.vmem [resolvable:$false] %s2715_s11 }
  0xdd   : > { %2235 = vmatprep.subr.bf16.mxu0 %v2234_v15  ;;  %p2713_p12 = pnand %p2712_p6, %p3574_p9  ;;  %s2717_s19 = scalar_lea.vmem %s2716_s11, 512 }
  0xde   : > { %p2718_p1 = scmp.lt.s32.totalorder %s3466_s21, %s2716_s11  ;;  %p2719_p3 = scmp.lt.s32.totalorder %s2717_s19, %s2711_s17 }
  0xdf   : > { %p2714_p13 = pneg %p2713_p12 }
  0xe0   : > { %2237 = vmatpush3.bf16.msra.mxu0 %v2234_v15  ;;  %p2720_p2 = por %p2719_p3, %p2718_p1 }
  0xe1   : > { %2252 = vmatprep.subr.bf16.mxu0 %v2832_v23 }
  0xe2   : > { %p2721_p8 = pnand %p2720_p2, %p2714_p13 }
  0xe3   : > { %2121 = vmatmul.mubr.msk.f32.vlgmr.msra.gmra.mrb[0].mxu0 %vm436_vm0, %v420_v16 }
  0xe4   : > { %2254 = vmatpush3.bf16.msra.mxu0 %v3183_v22  ;;  %2153 = vmatprep.mubr.msk.f32.mxu0 %vm2833_vm1, %v2834_v27 }
  0xe5   : > { %2255 = vmatprep.subr.bf16.mxu0 %v2832_v23 }
  0xe8   : > { %2257 = vmatpush3.bf16.msra.mxu0 %v3189_v26 }
  0xe9   : > { %2264 = vmatprep.subr.bf16.mxu0 %v2832_v23 }
 0x1b6   : > { %v2122_v29 = vpop.f32.mrb[0].mxu0 }
 0x1b7   : > { %v509_v30 = vpop.f32.mrb[1].mxu0  ;;  %v515_v32 = vadd.f32 %v2122_v29, %v2007_v28 }
 0x1b8   : > { %v510_v31 = vadd.f32 %v2007_v28, %v509_v30 }
 0x1ba   : > { %2131 = vmatprep.mubr.msk.f32.mxu1 %vm529_vm2, %v510_v31 }
 0x1bb   : > { %2132 = vmatmul.mubr.msk.f32.vlgmr.msra.gmra.mrb[0].mxu1 %vm529_vm2, %v515_v32 }
 0x1bc   : > { %2248 = vmatpush3.bf16.msra.mxu1 %v3183_v22  ;;  %2142 = vmatprep.mubr.msk.f32.mxu1 %vm2833_vm1, %v2834_v27 }
 0x1bd   : > { %2249 = vmatprep.subr.bf16.mxu1 %v2832_v23 }
 0x1c0   : > { %2251 = vmatpush3.bf16.msra.mxu1 %v3189_v26 }
 0x1c1   : > { %2258 = vmatprep.subr.bf16.mxu1 %v2832_v23 }
 0x1c3   : > { %2143 = vmatmul.mubr.f32.vlgmr.msra.gmra.mrb[2].mxu1 %v2834_v27 }
 0x1c4   : > { %2260 = vmatpush3.bf16.msra.mxu1 %v3183_v22  ;;  %2164 = vmatprep.mubr.msk.f32.mxu1 %vm2833_vm1, %v2834_v27 }
 0x1c5   : > { %2261 = vmatprep.subr.bf16.mxu1 %v2832_v23 }
 0x1c8   : > { %2263 = vmatpush3.bf16.msra.mxu1 %v3189_v26 }
 0x1c9   : > { %2270 = vmatprep.subr.bf16.mxu1 %v2832_v23 }
 0x28e   : > { %v2133_v33 = vpop.f32.mrb[0].mxu1 }
 0x28f   : > { %v602_v34 = vpop.f32.mrb[1].mxu1  ;;  %v3215_v41 = vadd.f32 %v2133_v33, %v2010_v40 }
 0x290   : > { %v3218_v43 = vadd.f32 %v2010_v40, %v602_v34 }
 0x296   : > { %v691_v36 = vpop.f32.mrb[2].mxu1 }
 0x297   : > { %v692_v37 = vadd.f32 %v3210_v35, %v691_v36  ;;  %v2144_v38 = vpop.f32.mrb[3].mxu1 }
 0x299   : > { %v696_v39 = vrot.slane %v692_v37, 1  ;;  %v699_v44 = vadd.f32 %v692_v37, %v3218_v43 }
 0x29b   : > { %715 = vrot.lane.b32.xlu0 %v696_v39, %s2835_s12  ;;  %v700_v42 = vadd.f32 %v696_v39, %v3215_v41  ;;  %v2014_v46 = vmul.f32 -1.442695, %v699_v44 }
 0x29d   : > { %v2015_v45 = vmul.f32 -1.442695, %v700_v42 }
 0x29f   : > { %713 = vrot.lane.b32.xlu0 %v692_v37, %s2835_s12  ;;  %2417 = vpow2.f32 %v2015_v45 }
 0x2a0   : > { %2419 = vpow2.f32 %v2014_v46 }
 0x2a9   : > { %v2418_v47 = vpop.eup %2417 }
 0x2aa   : > { %v708_v48 = vadd.f32 1.0, %v2418_v47  ;;  %v2420_v49 = vpop.eup %2419 }
 0x2ab   : > { %v707_v50 = vadd.f32 1.0, %v2420_v49 }
 0x2ac   : > { %2421 = vrcp.f32 %v708_v48 }
 0x2ad   : > { %2423 = vrcp.f32 %v707_v50 }
 0x2b6   : > { %v2422_v51 = vpop.eup %2421 }
 0x2b7   : > { %v2424_v54 = vpop.eup %2423  ;;  %v734_v63 = vsub.f32 1.0, %v2422_v51  ;;  %v746_v1 = vmul.f32 0.0, %v2422_v51 }
 0x2b8   : > { %v733_v4 = vsub.f32 1.0, %v2424_v54  ;;  %v745_v6 = vmul.f32 0.0, %v2424_v54 }
 0x30d   : > { %v716_v52 = vpop.permute.xlu0 %715 }
 0x30e   : > { %v720_v53 = vmul.f32 %v2422_v51, %v716_v52 }
 0x310   : > { %725 = vrot.lane.b32.xlu1 %v720_v53, %s2835_s12 }
 0x311   : > { %v714_v55 = vpop.permute.xlu0 %713 }
 0x312   : > { %v719_v56 = vmul.f32 %v2424_v54, %v714_v55 }
 0x314   : > { %723 = vrot.lane.b32.xlu1 %v719_v56, %s2835_s12 }
 0x382   : > { %v726_v57 = vpop.permute.xlu1 %725 }
 0x383   : > { %v730_v58 = vadd.f32 %v726_v57, %v3215_v41 }
 0x385   : > { %2425 = vtanh.f32 %v730_v58 }
 0x386   : > { %v724_v59 = vpop.permute.xlu1 %723 }
 0x387   : > { %v729_v60 = vadd.f32 %v724_v59, %v3218_v43 }
 0x389   : > { %2427 = vtanh.f32 %v729_v60 }
 0x38f   : > { %v2426_v61 = vpop.eup %2425 }
 0x390   : > { %739 = vrot.lane.b32.xlu0 %v2426_v61, %s2836_s9 }
 0x393   : > { %v2428_v62 = vpop.eup %2427 }
 0x394   : > { %737 = vrot.lane.b32.xlu1 %v2428_v62, %s2836_s9 }
 0x402   : > { %v740_v0 = vpop.permute.xlu0 %739 }
 0x403   : > { %v744_v2 = vmul.f32 %v740_v0, %v734_v63 }
 0x405   : > { %v3227_v3 = vadd.f32 %v746_v1, %v744_v2 }
 0x406   : > { %v738_v5 = vpop.permute.xlu1 %737 }
 0x407   : > { %v743_v7 = vmul.f32 %v738_v5, %v733_v4  ;;  %v760_v8 = vrot.slane %v3227_v3, 7 }
 0x409   : > { %v3230_v9 = vadd.f32 %v745_v6, %v743_v7 }
 0x40b   : > { %v762_v10 = vsel %vm761_vm3, %v760_v8, %v3230_v9  ;;  %v887_v46 = vrot.slane %v3230_v9, 7 }
 0x40c   : > { %763 = vrot.lane.b32.xlu0 %v762_v10, %s2836_s9 }
 0x47e   : > { %v764_v11 = vpop.permute.xlu0 %763 }
 0x47f   : > { %2154 = vmatmul.mubr.msk.f32.vlgmr.msra.gmra.mrb[2].mxu0 %vm529_vm2, %v764_v11 }
 0x480   : > { %2266 = vmatpush3.bf16.msra.mxu0 %v3183_v22  ;;  %2175 = vmatprep.mubr.msk.f32.mxu0 %vm2833_vm1, %v2834_v27 }
 0x481   : > { %2267 = vmatprep.subr.bf16.mxu0 %v2832_v23 }
 0x484   : > { %2269 = vmatpush3.bf16.msra.mxu0 %v3189_v26 }
 0x485   : > { %2276 = vmatprep.subr.bf16.mxu0 %v2832_v23 }
 0x552   : > { %v833_v12 = vpop.f32.mrb[2].mxu0 }
 0x553   : > { %v834_v13 = vadd.f32 %v3210_v35, %v833_v12  ;;  %v2155_v14 = vpop.f32.mrb[3].mxu0 }
 0x555   : > { %857 = vrot.lane.b32.xlu0 %v834_v13, %s2835_s12  ;;  %v838_v15 = vrot.slane %v834_v13, 7  ;;  %v842_v16 = vadd.f32 %v834_v13, %v3215_v41 }
 0x557   : > { %855 = vrot.lane.b32.xlu1 %v838_v15, %s2835_s12  ;;  %v841_v17 = vadd.f32 %v838_v15, %v3218_v43  ;;  %v2018_v18 = vmul.f32 -1.442695, %v842_v16 }
 0x559   : > { %v2017_v19 = vmul.f32 -1.442695, %v841_v17  ;;  %2429 = vpow2.f32 %v2018_v18 }
 0x55b   : > { %2431 = vpow2.f32 %v2017_v19 }
 0x563   : > { %v2430_v20 = vpop.eup %2429 }
 0x564   : > { %v850_v24 = vadd.f32 1.0, %v2430_v20 }
 0x565   : > { %v2432_v21 = vpop.eup %2431 }
 0x566   : > { %v849_v25 = vadd.f32 1.0, %v2432_v21  ;;  %2433 = vrcp.f32 %v850_v24 }
 0x568   : > { %2435 = vrcp.f32 %v849_v25 }
 0x570   : > { %v2434_v28 = vpop.eup %2433 }
 0x571   : > { %v876_v44 = vsub.f32 1.0, %v2434_v28  ;;  %v891_v51 = vmul.f32 %v2434_v28, %v760_v8 }
 0x572   : > { %v2436_v31 = vpop.eup %2435 }
 0x573   : > { %v875_v45 = vsub.f32 1.0, %v2436_v31  ;;  %v890_v49 = vmul.f32 %v2436_v31, %v887_v46 }
 0x5c7   : > { %v858_v29 = vpop.permute.xlu0 %857 }
 0x5c8   : > { %v862_v30 = vmul.f32 %v2434_v28, %v858_v29 }
 0x5c9   : > { %v856_v32 = vpop.permute.xlu1 %855 }
 0x5ca   : > { %v861_v33 = vmul.f32 %v2436_v31, %v856_v32  ;;  %867 = vrot.lane.b32.xlu0 %v862_v30, %s2835_s12 }
 0x5cc   : > { %865 = vrot.lane.b32.xlu1 %v861_v33, %s2835_s12 }
 0x63c   : > { %v868_v34 = vpop.permute.xlu0 %867 }
 0x63d   : > { %v872_v36 = vadd.f32 %v868_v34, %v3215_v41 }
 0x63e   : > { %v866_v37 = vpop.permute.xlu1 %865 }
 0x63f   : > { %2437 = vtanh.f32 %v872_v36  ;;  %v871_v38 = vadd.f32 %v866_v37, %v3218_v43 }
 0x641   : > { %2439 = vtanh.f32 %v871_v38 }
 0x649   : > { %v2438_v39 = vpop.eup %2437 }
 0x64a   : > { %881 = vrot.lane.b32.xlu0 %v2438_v39, %s2836_s9 }
 0x64b   : > { %v2440_v40 = vpop.eup %2439 }
 0x64c   : > { %879 = vrot.lane.b32.xlu1 %v2440_v40, %s2836_s9 }
 0x6bc   : > { %v882_v42 = vpop.permute.xlu0 %881 }
 0x6bd   : > { %v886_v48 = vmul.f32 %v882_v42, %v876_v44 }
 0x6be   : > { %v880_v47 = vpop.permute.xlu1 %879 }
 0x6bf   : > { %v885_v50 = vmul.f32 %v880_v47, %v875_v45  ;;  %v3256_v53 = vadd.f32 %v891_v51, %v886_v48 }
 0x6c1   : > { %v3254_v52 = vadd.f32 %v890_v49, %v885_v50  ;;  %v1033_v21 = vrot.slane %v3256_v53, 7 }
 0x6c3   : > { %v905_v54 = vrot.slane %v3254_v52, 1  ;;  %v1032_v28 = vrot.slane %v3254_v52, 7 }
 0x6c5   : > { %v906_v55 = vsel %vm761_vm3, %v3256_v53, %v905_v54 }
 0x6c6   : > { %907 = vrot.lane.b32.xlu1 %v906_v55, %s2836_s9 }
 0x738   : > { %v908_v56 = vpop.permute.xlu1 %907 }
 0x739   : > { %2165 = vmatmul.mubr.msk.f32.vlgmr.msra.gmra.mrb[4].mxu1 %vm529_vm2, %v908_v56 }
 0x73a   : > { %2272 = vmatpush3.bf16.msra.mxu1 %v3183_v22  ;;  %2186 = vmatprep.mubr.msk.f32.mxu1 %vm2833_vm1, %v2834_v27 }
 0x73b   : > { %2273 = vmatprep.subr.bf16.mxu1 %v2832_v23 }
 0x73e   : > { %2275 = vmatpush3.bf16.msra.mxu1 %v3189_v26 }
 0x73f   : > { %2282 = vmatprep.subr.bf16.mxu1 %v2832_v23 }
 0x80c   : > { %v977_v57 = vpop.f32.mrb[4].mxu1 }
 0x80d   : > { %v978_v58 = vadd.f32 %v3210_v35, %v977_v57  ;;  %v2166_v59 = vpop.f32.mrb[5].mxu1 }
 0x80f   : > { %v982_v60 = vrot.slane %v978_v58, 6  ;;  %v983_v61 = vrot.slane %v978_v58, 7 }
 0x811   : > { %1002 = vrot.lane.b32.xlu1 %v983_v61, %s2835_s12  ;;  %1000 = vrot.lane.b32.xlu0 %v982_v60, %s2835_s12  ;;  %v986_v62 = vadd.f32 %v982_v60, %v3218_v43  ;;  %v987_v63 = vadd.f32 %v983_v61, %v3215_v41 }
 0x813   : > { %v2020_v0 = vmul.f32 -1.442695, %v986_v62  ;;  %v2021_v1 = vmul.f32 -1.442695, %v987_v63 }
 0x815   : > { %2441 = vpow2.f32 %v2020_v0 }
 0x816   : > { %2443 = vpow2.f32 %v2021_v1 }
 0x81f   : > { %v2442_v2 = vpop.eup %2441 }
 0x820   : > { %v2444_v4 = vpop.eup %2443  ;;  %v994_v5 = vadd.f32 1.0, %v2442_v2 }
 0x821   : > { %v995_v6 = vadd.f32 1.0, %v2444_v4 }
 0x822   : > { %2445 = vrcp.f32 %v994_v5 }
 0x823   : > { %2447 = vrcp.f32 %v995_v6 }
 0x82c   : > { %v2446_v7 = vpop.eup %2445 }
 0x82d   : > { %v2448_v8 = vpop.eup %2447  ;;  %v1020_v25 = vsub.f32 1.0, %v2446_v7  ;;  %v1036_v32 = vmul.f32 %v2446_v7, %v1032_v28 }
 0x82e   : > { %v1021_v20 = vsub.f32 1.0, %v2448_v8  ;;  %v1037_v29 = vmul.f32 %v2448_v8, %v1033_v21 }
 0x883   : > { %v1003_v10 = vpop.permute.xlu1 %1002  ;;  %v1001_v11 = vpop.permute.xlu0 %1000 }
 0x884   : > { %v1007_v12 = vmul.f32 %v2448_v8, %v1003_v10  ;;  %v1006_v13 = vmul.f32 %v2446_v7, %v1001_v11 }
 0x886   : > { %1012 = vrot.lane.b32.xlu1 %v1007_v12, %s2835_s12  ;;  %1010 = vrot.lane.b32.xlu0 %v1006_v13, %s2835_s12 }
 0x8f8   : > { %v1013_v14 = vpop.permute.xlu1 %1012  ;;  %v1011_v15 = vpop.permute.xlu0 %1010 }
 0x8f9   : > { %v1017_v16 = vadd.f32 %v1013_v14, %v3215_v41  ;;  %v1016_v17 = vadd.f32 %v1011_v15, %v3218_v43 }
 0x8fb   : > { %2449 = vtanh.f32 %v1017_v16 }
 0x8fc   : > { %2451 = vtanh.f32 %v1016_v17 }
 0x905   : > { %v2450_v18 = vpop.eup %2449 }
 0x906   : > { %v2452_v19 = vpop.eup %2451  ;;  %1026 = vrot.lane.b32.xlu1 %v2450_v18, %s2836_s9 }
 0x907   : > { %1024 = vrot.lane.b32.xlu0 %v2452_v19, %s2836_s9 }
 0x978   : > { %v1027_v24 = vpop.permute.xlu1 %1026 }
 0x979   : > { %v1031_v30 = vmul.f32 %v1027_v24, %v1021_v20  ;;  %v1025_v31 = vpop.permute.xlu0 %1024 }
 0x97a   : > { %v1030_v33 = vmul.f32 %v1025_v31, %v1020_v25 }
 0x97b   : > { %v3282_v34 = vadd.f32 %v1037_v29, %v1031_v30 }
 0x97c   : > { %v3284_v36 = vadd.f32 %v1036_v32, %v1030_v33 }
 0x97d   : > { %v1052_v37 = vrot.slane %v3282_v34, 1  ;;  %v1180_v8 = vrot.slane %v3282_v34, 7 }
 0x97e   : > { %v1051_v38 = vrot.slane %v3284_v36, 2  ;;  %v1179_v12 = vrot.slane %v3284_v36, 7 }
 0x980   : > { %v1053_v39 = vsel %vm761_vm3, %v1052_v37, %v1051_v38 }
 0x981   : > { %1054 = vrot.lane.b32.xlu0 %v1053_v39, %s2836_s9 }
 0x9f3   : > { %v1055_v40 = vpop.permute.xlu0 %1054 }
 0x9f4   : > { %2176 = vmatmul.mubr.msk.f32.vlgmr.msra.gmra.mrb[4].mxu0 %vm529_vm2, %v1055_v40 }
 0x9f5   : > { %2278 = vmatpush3.bf16.msra.mxu0 %v3183_v22  ;;  %2197 = vmatprep.mubr.msk.f32.mxu0 %vm2833_vm1, %v2834_v27 }
 0x9f6   : > { %2279 = vmatprep.subr.bf16.mxu0 %v2832_v23 }
 0x9f9   : > { %2281 = vmatpush3.bf16.msra.mxu0 %v3189_v26 }
 0x9fa   : > { %2288 = vmatprep.subr.bf16.mxu0 %v2832_v23 }
 0xac7   : > { %v1124_v42 = vpop.f32.mrb[4].mxu0 }
 0xac8   : > { %v1125_v44 = vadd.f32 %v3210_v35, %v1124_v42  ;;  %v2177_v45 = vpop.f32.mrb[5].mxu0 }
 0xaca   : > { %v1129_v46 = vrot.slane %v1125_v44, 5  ;;  %v1130_v47 = vrot.slane %v1125_v44, 6 }
 0xacc   : > { %1149 = vrot.lane.b32.xlu0 %v1130_v47, %s2835_s12  ;;  %1147 = vrot.lane.b32.xlu1 %v1129_v46, %s2835_s12  ;;  %v1133_v48 = vadd.f32 %v1129_v46, %v3218_v43  ;;  %v1134_v49 = vadd.f32 %v1130_v47, %v3215_v41 }
 0xace   : > { %v2023_v50 = vmul.f32 -1.442695, %v1133_v48  ;;  %v2024_v51 = vmul.f32 -1.442695, %v1134_v49 }
 0xad0   : > { %2453 = vpow2.f32 %v2023_v50 }
 0xad1   : > { %2455 = vpow2.f32 %v2024_v51 }
 0xada   : > { %v2454_v54 = vpop.eup %2453 }
 0xadb   : > { %v2456_v55 = vpop.eup %2455  ;;  %v1141_v56 = vadd.f32 1.0, %v2454_v54 }
 0xadc   : > { %v1142_v57 = vadd.f32 1.0, %v2456_v55 }
 0xadd   : > { %2457 = vrcp.f32 %v1141_v56 }
 0xade   : > { %2459 = vrcp.f32 %v1142_v57 }
 0xae7   : > { %v2458_v58 = vpop.eup %2457 }
 0xae8   : > { %v2460_v59 = vpop.eup %2459  ;;  %v1167_v11 = vsub.f32 1.0, %v2458_v58  ;;  %v1183_v16 = vmul.f32 %v2458_v58, %v1179_v12 }
 0xae9   : > { %v1168_v7 = vsub.f32 1.0, %v2460_v59  ;;  %v1184_v13 = vmul.f32 %v2460_v59, %v1180_v8 }
 0xb3e   : > { %v1150_v60 = vpop.permute.xlu0 %1149  ;;  %v1148_v61 = vpop.permute.xlu1 %1147 }
 0xb3f   : > { %v1154_v62 = vmul.f32 %v2460_v59, %v1150_v60  ;;  %v1153_v63 = vmul.f32 %v2458_v58, %v1148_v61 }
 0xb41   : > { %1159 = vrot.lane.b32.xlu0 %v1154_v62, %s2835_s12  ;;  %1157 = vrot.lane.b32.xlu1 %v1153_v63, %s2835_s12 }
 0xbb3   : > { %v1160_v0 = vpop.permute.xlu0 %1159  ;;  %v1158_v1 = vpop.permute.xlu1 %1157 }
 0xbb4   : > { %v1164_v2 = vadd.f32 %v1160_v0, %v3215_v41  ;;  %v1163_v4 = vadd.f32 %v1158_v1, %v3218_v43 }
 0xbb6   : > { %2461 = vtanh.f32 %v1164_v2 }
 0xbb7   : > { %2463 = vtanh.f32 %v1163_v4 }
 0xbc0   : > { %v2462_v5 = vpop.eup %2461 }
 0xbc1   : > { %v2464_v6 = vpop.eup %2463  ;;  %1173 = vrot.lane.b32.xlu0 %v2462_v5, %s2836_s9 }
 0xbc2   : > { %1171 = vrot.lane.b32.xlu1 %v2464_v6, %s2836_s9 }
 0xc33   : > { %v1174_v10 = vpop.permute.xlu0 %1173 }
 0xc34   : > { %v1178_v14 = vmul.f32 %v1174_v10, %v1168_v7  ;;  %v1172_v15 = vpop.permute.xlu1 %1171 }
 0xc35   : > { %v1177_v17 = vmul.f32 %v1172_v15, %v1167_v11 }
 0xc36   : > { %v3310_v18 = vadd.f32 %v1184_v13, %v1178_v14 }
 0xc37   : > { %v3312_v19 = vadd.f32 %v1183_v16, %v1177_v17 }
 0xc38   : > { %v1199_v20 = vrot.slane %v3310_v18, 2  ;;  %v1327_v61 = vrot.slane %v3310_v18, 7 }
 0xc39   : > { %v1198_v21 = vrot.slane %v3312_v19, 3  ;;  %v1326_v0 = vrot.slane %v3312_v19, 7 }
 0xc3b   : > { %v1200_v24 = vsel %vm761_vm3, %v1199_v20, %v1198_v21 }
 0xc3c   : > { %1201 = vrot.lane.b32.xlu1 %v1200_v24, %s2836_s9 }
 0xcae   : > { %v1202_v25 = vpop.permute.xlu1 %1201 }
 0xcaf   : > { %2187 = vmatmul.mubr.msk.f32.vlgmr.msra.gmra.mrb[6].mxu1 %vm529_vm2, %v1202_v25 }
 0xcb0   : > { %2284 = vmatpush3.bf16.msra.mxu1 %v3183_v22  ;;  %2208 = vmatprep.mubr.msk.f32.mxu1 %vm2833_vm1, %v2834_v27 }
 0xcb1   : > { %2285 = vmatprep.subr.bf16.mxu1 %v2832_v23 }
 0xcb4   : > { %2287 = vmatpush3.bf16.msra.mxu1 %v3189_v26 }
 0xd82   : > { %v1271_v28 = vpop.f32.mrb[6].mxu1 }
 0xd83   : > { %v1272_v29 = vadd.f32 %v3210_v35, %v1271_v28  ;;  %v2188_v30 = vpop.f32.mrb[7].mxu1 }
 0xd85   : > { %v1276_v31 = vrot.slane %v1272_v29, 4  ;;  %v1277_v32 = vrot.slane %v1272_v29, 5 }
 0xd87   : > { %1296 = vrot.lane.b32.xlu1 %v1277_v32, %s2835_s12  ;;  %1294 = vrot.lane.b32.xlu0 %v1276_v31, %s2835_s12  ;;  %v1280_v33 = vadd.f32 %v1276_v31, %v3218_v43  ;;  %v1281_v37 = vadd.f32 %v1277_v32, %v3215_v41 }
 0xd89   : > { %v2026_v38 = vmul.f32 -1.442695, %v1280_v33  ;;  %v2027_v39 = vmul.f32 -1.442695, %v1281_v37 }
 0xd8b   : > { %2465 = vpow2.f32 %v2026_v38 }
 0xd8c   : > { %2467 = vpow2.f32 %v2027_v39 }
 0xd95   : > { %v2466_v40 = vpop.eup %2465 }
 0xd96   : > { %v2468_v42 = vpop.eup %2467  ;;  %v1288_v44 = vadd.f32 1.0, %v2466_v40 }
 0xd97   : > { %v1289_v45 = vadd.f32 1.0, %v2468_v42 }
 0xd98   : > { %2469 = vrcp.f32 %v1288_v44 }
 0xd99   : > { %2471 = vrcp.f32 %v1289_v45 }
 0xda2   : > { %v2470_v46 = vpop.eup %2469 }
 0xda3   : > { %v2472_v47 = vpop.eup %2471  ;;  %v1314_v63 = vsub.f32 1.0, %v2470_v46  ;;  %v1330_v5 = vmul.f32 %v2470_v46, %v1326_v0 }
 0xda4   : > { %v1315_v60 = vsub.f32 1.0, %v2472_v47  ;;  %v1331_v1 = vmul.f32 %v2472_v47, %v1327_v61 }
 0xdf9   : > { %v1297_v48 = vpop.permute.xlu1 %1296  ;;  %v1295_v49 = vpop.permute.xlu0 %1294 }
 0xdfa   : > { %v1301_v50 = vmul.f32 %v2472_v47, %v1297_v48  ;;  %v1300_v51 = vmul.f32 %v2470_v46, %v1295_v49 }
 0xdfc   : > { %1306 = vrot.lane.b32.xlu1 %v1301_v50, %s2835_s12  ;;  %1304 = vrot.lane.b32.xlu0 %v1300_v51, %s2835_s12 }
 0xe6e   : > { %v1307_v54 = vpop.permute.xlu1 %1306  ;;  %v1305_v55 = vpop.permute.xlu0 %1304 }
 0xe6f   : > { %v1311_v56 = vadd.f32 %v1307_v54, %v3215_v41  ;;  %v1310_v57 = vadd.f32 %v1305_v55, %v3218_v43 }
 0xe71   : > { %2473 = vtanh.f32 %v1311_v56 }
 0xe72   : > { %2475 = vtanh.f32 %v1310_v57 }
 0xe7b   : > { %v2474_v58 = vpop.eup %2473 }
 0xe7c   : > { %v2476_v59 = vpop.eup %2475  ;;  %1320 = vrot.lane.b32.xlu1 %v2474_v58, %s2836_s9 }
 0xe7d   : > { %1318 = vrot.lane.b32.xlu0 %v2476_v59, %s2836_s9 }
 0xeee   : > { %v1321_v62 = vpop.permute.xlu1 %1320 }
 0xeef   : > { %v1325_v2 = vmul.f32 %v1321_v62, %v1315_v60  ;;  %v1319_v4 = vpop.permute.xlu0 %1318 }
 0xef0   : > { %v1324_v6 = vmul.f32 %v1319_v4, %v1314_v63 }
 0xef1   : > { %v3337_v7 = vadd.f32 %v1331_v1, %v1325_v2 }
 0xef2   : > { %v3339_v8 = vadd.f32 %v1330_v5, %v1324_v6 }
 0xef3   : > { %v1346_v10 = vrot.slane %v3337_v7, 3  ;;  %v1474_v47 = vrot.slane %v3337_v7, 7 }
 0xef4   : > { %v1345_v11 = vrot.slane %v3339_v8, 4  ;;  %v1473_v50 = vrot.slane %v3339_v8, 7 }
 0xef6   : > { %v1347_v12 = vsel %vm761_vm3, %v1346_v10, %v1345_v11 }
 0xef7   : > { %1348 = vrot.lane.b32.xlu0 %v1347_v12, %s2836_s9 }
 0xf69   : > { %v1349_v13 = vpop.permute.xlu0 %1348 }
 0xf6a   : > { %2198 = vmatmul.mubr.msk.f32.vlgmr.msra.gmra.mrb[6].mxu0 %vm529_vm2, %v1349_v13 }
 0xf6b   : > { %2290 = vmatpush3.bf16.msra.mxu0 %v3183_v22  ;;  %2219 = vmatprep.mubr.msk.f32.mxu0 %vm2833_vm1, %v2834_v27 }
 0xf6c   : > { %2291 = vmatprep.subr.bf16.mxu0 %v2832_v23 }
 0xf6f   : > { %2293 = vmatpush3.bf16.msra.mxu0 %v3189_v26 }
0x103d   : > { %v1418_v14 = vpop.f32.mrb[6].mxu0 }
0x103e   : > { %v1419_v15 = vadd.f32 %v3210_v35, %v1418_v14  ;;  %v2199_v16 = vpop.f32.mrb[7].mxu0 }
0x1040   : > { %v1423_v17 = vrot.slane %v1419_v15, 3  ;;  %v1424_v20 = vrot.slane %v1419_v15, 4 }
0x1042   : > { %1443 = vrot.lane.b32.xlu0 %v1424_v20, %s2835_s12  ;;  %1441 = vrot.lane.b32.xlu1 %v1423_v17, %s2835_s12  ;;  %v1427_v21 = vadd.f32 %v1423_v17, %v3218_v43  ;;  %v1428_v22 = vadd.f32 %v1424_v20, %v3215_v41 }
0x1044   : > { %v2029_v24 = vmul.f32 -1.442695, %v1427_v21  ;;  %v2030_v27 = vmul.f32 -1.442695, %v1428_v22 }
0x1046   : > { %2477 = vpow2.f32 %v2029_v24 }
0x1047   : > { %2479 = vpow2.f32 %v2030_v27 }
0x1050   : > { %v2478_v23 = vpop.eup %2477 }
0x1051   : > { %v2480_v26 = vpop.eup %2479  ;;  %v1435_v25 = vadd.f32 1.0, %v2478_v23 }
0x1052   : > { %v1436_v28 = vadd.f32 1.0, %v2480_v26 }
0x1053   : > { %2481 = vrcp.f32 %v1435_v25 }
0x1054   : > { %2483 = vrcp.f32 %v1436_v28 }
0x105d   : > { %v2482_v29 = vpop.eup %2481 }
0x105e   : > { %v2484_v30 = vpop.eup %2483  ;;  %v1461_v49 = vsub.f32 1.0, %v2482_v29  ;;  %v1477_v56 = vmul.f32 %v2482_v29, %v1473_v50 }
0x105f   : > { %v1462_v46 = vsub.f32 1.0, %v2484_v30  ;;  %v1478_v51 = vmul.f32 %v2484_v30, %v1474_v47 }
0x10b4   : > { %v1444_v31 = vpop.permute.xlu0 %1443  ;;  %v1442_v32 = vpop.permute.xlu1 %1441 }
0x10b5   : > { %v1448_v33 = vmul.f32 %v2484_v30, %v1444_v31  ;;  %v1447_v37 = vmul.f32 %v2482_v29, %v1442_v32 }
0x10b7   : > { %1453 = vrot.lane.b32.xlu0 %v1448_v33, %s2835_s12  ;;  %1451 = vrot.lane.b32.xlu1 %v1447_v37, %s2835_s12 }
0x1129   : > { %v1454_v38 = vpop.permute.xlu0 %1453  ;;  %v1452_v39 = vpop.permute.xlu1 %1451 }
0x112a   : > { %v1458_v40 = vadd.f32 %v1454_v38, %v3215_v41  ;;  %v1457_v42 = vadd.f32 %v1452_v39, %v3218_v43 }
0x112c   : > { %2485 = vtanh.f32 %v1458_v40 }
0x112d   : > { %2487 = vtanh.f32 %v1457_v42 }
0x1136   : > { %v2486_v44 = vpop.eup %2485 }
0x1137   : > { %v2488_v45 = vpop.eup %2487  ;;  %1467 = vrot.lane.b32.xlu0 %v2486_v44, %s2836_s9 }
0x1138   : > { %1465 = vrot.lane.b32.xlu1 %v2488_v45, %s2836_s9 }
0x11a9   : > { %v1468_v48 = vpop.permute.xlu0 %1467 }
0x11aa   : > { %v1472_v54 = vmul.f32 %v1468_v48, %v1462_v46  ;;  %v1466_v55 = vpop.permute.xlu1 %1465 }
0x11ab   : > { %v1471_v57 = vmul.f32 %v1466_v55, %v1461_v49 }
0x11ac   : > { %v3364_v58 = vadd.f32 %v1478_v51, %v1472_v54 }
0x11ad   : > { %v3366_v59 = vadd.f32 %v1477_v56, %v1471_v57 }
0x11ae   : > { %v1493_v60 = vrot.slane %v3364_v58, 4  ;;  %v1621_v32 = vrot.slane %v3364_v58, 7 }
0x11af   : > { %v1492_v61 = vrot.slane %v3366_v59, 5  ;;  %v1620_v38 = vrot.slane %v3366_v59, 7 }
0x11b1   : > { %v1494_v62 = vsel %vm761_vm3, %v1493_v60, %v1492_v61 }
0x11b2   : > { %1495 = vrot.lane.b32.xlu1 %v1494_v62, %s2836_s9 }
0x1224   : > { %v1496_v63 = vpop.permute.xlu1 %1495 }
0x1225   : > { %2209 = vmatmul.mubr.msk.f32.vlgmr.msra.gmra.mrb[8].mxu1 %vm529_vm2, %v1496_v63 }
0x12f8   : > { %v1565_v0 = vpop.f32.mrb[8].mxu1 }
0x12f9   : > { %v1566_v1 = vadd.f32 %v3210_v35, %v1565_v0  ;;  %v2210_v2 = vpop.f32.mrb[9].mxu1 }
0x12fb   : > { %v1570_v4 = vrot.slane %v1566_v1, 2  ;;  %v1571_v5 = vrot.slane %v1566_v1, 3 }
0x12fd   : > { %1590 = vrot.lane.b32.xlu1 %v1571_v5, %s2835_s12  ;;  %1588 = vrot.lane.b32.xlu0 %v1570_v4, %s2835_s12  ;;  %v1574_v6 = vadd.f32 %v1570_v4, %v3218_v43  ;;  %v1575_v10 = vadd.f32 %v1571_v5, %v3215_v41 }
0x12ff   : > { %v2032_v11 = vmul.f32 -1.442695, %v1574_v6  ;;  %v2033_v12 = vmul.f32 -1.442695, %v1575_v10 }
0x1301   : > { %2489 = vpow2.f32 %v2032_v11 }
0x1302   : > { %2491 = vpow2.f32 %v2033_v12 }
0x130b   : > { %v2490_v13 = vpop.eup %2489 }
0x130c   : > { %v2492_v14 = vpop.eup %2491  ;;  %v1582_v15 = vadd.f32 1.0, %v2490_v13 }
0x130d   : > { %v1583_v16 = vadd.f32 1.0, %v2492_v14 }
0x130e   : > { %2493 = vrcp.f32 %v1582_v15 }
0x130f   : > { %2495 = vrcp.f32 %v1583_v16 }
0x1318   : > { %v2494_v17 = vpop.eup %2493 }
0x1319   : > { %v2496_v20 = vpop.eup %2495  ;;  %v1608_v37 = vsub.f32 1.0, %v2494_v17  ;;  %v1624_v44 = vmul.f32 %v2494_v17, %v1620_v38 }
0x131a   : > { %v1609_v31 = vsub.f32 1.0, %v2496_v20  ;;  %v1625_v39 = vmul.f32 %v2496_v20, %v1621_v32 }
0x136f   : > { %v1591_v21 = vpop.permute.xlu1 %1590  ;;  %v1589_v22 = vpop.permute.xlu0 %1588 }
0x1370   : > { %v1595_v24 = vmul.f32 %v2496_v20, %v1591_v21  ;;  %v1594_v27 = vmul.f32 %v2494_v17, %v1589_v22 }
0x1372   : > { %1600 = vrot.lane.b32.xlu1 %v1595_v24, %s2835_s12  ;;  %1598 = vrot.lane.b32.xlu0 %v1594_v27, %s2835_s12 }
0x13e4   : > { %v1601_v23 = vpop.permute.xlu1 %1600  ;;  %v1599_v26 = vpop.permute.xlu0 %1598 }
0x13e5   : > { %v1605_v25 = vadd.f32 %v1601_v23, %v3215_v41  ;;  %v1604_v28 = vadd.f32 %v1599_v26, %v3218_v43 }
0x13e7   : > { %2497 = vtanh.f32 %v1605_v25 }
0x13e8   : > { %2499 = vtanh.f32 %v1604_v28 }
0x13f1   : > { %v2498_v29 = vpop.eup %2497 }
0x13f2   : > { %v2500_v30 = vpop.eup %2499  ;;  %1614 = vrot.lane.b32.xlu1 %v2498_v29, %s2836_s9 }
0x13f3   : > { %1612 = vrot.lane.b32.xlu0 %v2500_v30, %s2836_s9 }
0x1464   : > { %v1615_v33 = vpop.permute.xlu1 %1614 }
0x1465   : > { %v1619_v40 = vmul.f32 %v1615_v33, %v1609_v31  ;;  %v1613_v42 = vpop.permute.xlu0 %1612 }
0x1466   : > { %v1618_v45 = vmul.f32 %v1613_v42, %v1608_v37 }
0x1467   : > { %v3386_v46 = vadd.f32 %v1625_v39, %v1619_v40 }
0x1468   : > { %v3388_v47 = vadd.f32 %v1624_v44, %v1618_v45 }
0x1469   : > { %v1640_v48 = vrot.slane %v3386_v46, 5 }
0x146a   : > { %v1639_v49 = vrot.slane %v3388_v47, 6 }
0x146c   : > { %v1641_v50 = vsel %vm761_vm3, %v1640_v48, %v1639_v49 }
0x146d   : > { %1642 = vrot.lane.b32.xlu0 %v1641_v50, %s2836_s9 }
0x14df   : > { %v1643_v51 = vpop.permute.xlu0 %1642 }
0x14e0   : > { %2220 = vmatmul.mubr.msk.f32.vlgmr.msra.gmra.mrb[8].mxu0 %vm529_vm2, %v1643_v51 }
0x15b3   : > { %v1712_v54 = vpop.f32.mrb[8].mxu0 }
0x15b4   : > { %v1713_v55 = vadd.f32 %v3210_v35, %v1712_v54  ;;  %v2221_v56 = vpop.f32.mrb[9].mxu0 }
0x15b6   : > { %v1717_v57 = vrot.slane %v1713_v55, 1  ;;  %v1718_v60 = vrot.slane %v1713_v55, 2 }
0x15b8   : > { %1737 = vrot.lane.b32.xlu0 %v1718_v60, %s2835_s12  ;;  %1735 = vrot.lane.b32.xlu1 %v1717_v57, %s2835_s12  ;;  %v1721_v61 = vadd.f32 %v1717_v57, %v3218_v43  ;;  %v1722_v62 = vadd.f32 %v1718_v60, %v3215_v41 }
0x15ba   : > { %v2035_v63 = vmul.f32 -1.442695, %v1721_v61  ;;  %v2036_v0 = vmul.f32 -1.442695, %v1722_v62 }
0x15bc   : > { %2501 = vpow2.f32 %v2035_v63 }
0x15bd   : > { %2503 = vpow2.f32 %v2036_v0 }
0x15c6   : > { %v2502_v1 = vpop.eup %2501 }
0x15c7   : > { %v2504_v2 = vpop.eup %2503  ;;  %v1729_v4 = vadd.f32 1.0, %v2502_v1 }
0x15c8   : > { %v1730_v5 = vadd.f32 1.0, %v2504_v2 }
0x15c9   : > { %2505 = vrcp.f32 %v1729_v4 }
0x15ca   : > { %2507 = vrcp.f32 %v1730_v5 }
0x15d3   : > { %v2506_v35 = vpop.eup %2505 }
0x15d4   : > { %v2508_v6 = vpop.eup %2507 }
0x162a   : > { %v1738_v10 = vpop.permute.xlu0 %1737  ;;  %v1736_v11 = vpop.permute.xlu1 %1735 }
0x162b   : > { %v1742_v12 = vmul.f32 %v2508_v6, %v1738_v10  ;;  %v1741_v13 = vmul.f32 %v2506_v35, %v1736_v11 }
0x162d   : > { %1747 = vrot.lane.b32.xlu0 %v1742_v12, %s2835_s12  ;;  %1745 = vrot.lane.b32.xlu1 %v1741_v13, %s2835_s12 }
0x169f   : > { %v1748_v14 = vpop.permute.xlu0 %1747  ;;  %v1746_v15 = vpop.permute.xlu1 %1745 }
0x16a0   : > { %v1752_v16 = vadd.f32 %v1748_v14, %v3215_v41  ;;  %v1751_v17 = vadd.f32 %v1746_v15, %v3218_v43  ;;  %v1756_v41 = vsub.f32 1.0, %v2508_v6  ;;  %v1768_v43 = vrot.slane %v3386_v46, 7 }
0x16a2   : > { %2509 = vtanh.f32 %v1752_v16 }
0x16a3   : > { %2511 = vtanh.f32 %v1751_v17 }
0x16ac   : > { %v2510_v20 = vpop.eup %2509 }
0x16ad   : > { %v2512_v21 = vpop.eup %2511  ;;  %1761 = vrot.lane.b32.xlu0 %v2510_v20, %s2836_s9 }
0x16ae   : > { %1759 = vrot.lane.b32.xlu1 %v2512_v21, %s2836_s9 }
0x16b1   : > { %753 = vrot.lane.b32.xlu0 %v3227_v3, %s2836_s9 }
0x16b2   : > { %751 = vrot.lane.b32.xlu1 %v3230_v9, %s2836_s9  ;;  %v1755_v9 = vsub.f32 1.0, %v2506_v35 }
0x16b5   : > { %898 = vrot.lane.b32.xlu0 %v3256_v53, %s2836_s9  ;;  %v1772_v53 = vmul.f32 %v2508_v6, %v1768_v43 }
0x16b6   : > { %896 = vrot.lane.b32.xlu1 %v3254_v52, %s2836_s9  ;;  %v1767_v52 = vrot.slane %v3388_v47, 7 }
0x16b9   : > { %1044 = vrot.lane.b32.xlu0 %v3282_v34, %s2836_s9 }
0x16ba   : > { %1042 = vrot.lane.b32.xlu1 %v3284_v36, %s2836_s9 }
0x16bd   : > { %1191 = vrot.lane.b32.xlu0 %v3310_v18, %s2836_s9  ;;  %v1771_v18 = vmul.f32 %v2506_v35, %v1767_v52 }
0x16be   : > { %1189 = vrot.lane.b32.xlu1 %v3312_v19, %s2836_s9 }
0x16c1   : > { %1338 = vrot.lane.b32.xlu0 %v3337_v7, %s2836_s9 }
0x16c2   : > { %1336 = vrot.lane.b32.xlu1 %v3339_v8, %s2836_s9 }
0x16c5   : > { %1485 = vrot.lane.b32.xlu0 %v3364_v58, %s2836_s9 }
0x16c6   : > { %1483 = vrot.lane.b32.xlu1 %v3366_v59, %s2836_s9 }
0x16c9   : > { %1632 = vrot.lane.b32.xlu0 %v3386_v46, %s2836_s9 }
0x16ca   : > { %1630 = vrot.lane.b32.xlu1 %v3388_v47, %s2836_s9 }
0x171f   : > { %v1762_v3 = vpop.permute.xlu0 %1761 }
0x1720   : > { %v1766_v34 = vmul.f32 %v1762_v3, %v1756_v41  ;;  %v1760_v36 = vpop.permute.xlu1 %1759 }
0x1721   : > { %v1765_v19 = vmul.f32 %v1760_v36, %v1755_v9 }
0x1722   : > { %v1774_v7 = vadd.f32 %v1772_v53, %v1766_v34 }
0x1723   : > { %v1773_v8 = vadd.f32 %v1771_v18, %v1765_v19  ;;  %v754_v58 = vpop.permute.xlu0 %753 }
0x1724   : > { %759 = vst.msk [vmem:[%s3438_s13 + $0x8] sm:$0x1] %vm757_vm4, %v754_v58  ;;  %v752_v59 = vpop.permute.xlu1 %751  ;;  %1779 = vrot.lane.b32.xlu0 %v1774_v7, %s2836_s9 }
0x1725   : > { %758 = vst.msk [vmem:[%s3438_s13] sm:$0x1] %vm757_vm4, %v752_v59  ;;  %1777 = vrot.lane.b32.xlu1 %v1773_v8, %s2836_s9  ;;  %s3473_s9 = scalar_lea.hbm %s3550_s8, %s2047_s26 }
0x1727   : > { %v899_v22 = vpop.permute.xlu0 %898 }
0x1728   : > { %904 = vst.msk [vmem:[%s3438_s13 + $0x8] sm:$0x2] %vm902_vm5, %v899_v22  ;;  %v897_v24 = vpop.permute.xlu1 %896 }
0x1729   : > { %903 = vst.msk [vmem:[%s3438_s13] sm:$0x2] %vm902_vm5, %v897_v24 }
0x172b   : > { %v1045_v27 = vpop.permute.xlu0 %1044 }
0x172c   : > { %1050 = vst.msk [vmem:[%s3438_s13 + $0x8] sm:$0x4] %vm1048_vm6, %v1045_v27  ;;  %v1043_v23 = vpop.permute.xlu1 %1042 }
0x172d   : > { %1049 = vst.msk [vmem:[%s3438_s13] sm:$0x4] %vm1048_vm6, %v1043_v23 }
0x172f   : > { %v1192_v26 = vpop.permute.xlu0 %1191 }
0x1730   : > { %1197 = vst.msk [vmem:[%s3438_s13 + $0x8] sm:$0x8] %vm1195_vm7, %v1192_v26  ;;  %v1190_v25 = vpop.permute.xlu1 %1189 }
0x1731   : > { %1196 = vst.msk [vmem:[%s3438_s13] sm:$0x8] %vm1195_vm7, %v1190_v25 }
0x1733   : > { %v1339_v28 = vpop.permute.xlu0 %1338 }
0x1734   : > { %1344 = vst.msk [vmem:[%s3438_s13 + $0x8] sm:$0x10] %vm1342_vm8, %v1339_v28  ;;  %v1337_v29 = vpop.permute.xlu1 %1336 }
0x1735   : > { %1343 = vst.msk [vmem:[%s3438_s13] sm:$0x10] %vm1342_vm8, %v1337_v29 }
0x1737   : > { %v1486_v30 = vpop.permute.xlu0 %1485 }
0x1738   : > { %1491 = vst.msk [vmem:[%s3438_s13 + $0x8] sm:$0x20] %vm1489_vm9, %v1486_v30  ;;  %v1484_v31 = vpop.permute.xlu1 %1483 }
0x1739   : > { %1490 = vst.msk [vmem:[%s3438_s13] sm:$0x20] %vm1489_vm9, %v1484_v31 }
0x173b   : > { %v1633_v32 = vpop.permute.xlu0 %1632 }
0x173c   : > { %1638 = vst.msk [vmem:[%s3438_s13 + $0x8] sm:$0x40] %vm1636_vm10, %v1633_v32  ;;  %v1631_v33 = vpop.permute.xlu1 %1630 }
0x173d   : > { %1637 = vst.msk [vmem:[%s3438_s13] sm:$0x40] %vm1636_vm10, %v1631_v33 }
0x1796   : > { %v1780_v37 = vpop.permute.xlu0 %1779 }
0x1797   : > { %1785 = vst.msk [vmem:[%s3438_s13 + $0x8] sm:$0x80] %vm1783_vm11, %v1780_v37  ;;  %1787 = vst.msk [vmem:[%s415_s18 - $0x6] sm:$0x80] %vm1783_vm11, %v1780_v37  ;;  %v1778_v38 = vpop.permute.xlu1 %1777 }
0x1798   : > { %1784 = vst.msk [vmem:[%s3438_s13] sm:$0x80] %vm1783_vm11, %v1778_v38  ;;  %1786 = vst.msk [vmem:[%s415_s18 - $0x7] sm:$0x80] %vm1783_vm11, %v1778_v38 }
0x1799   : > { %2724 = shalt.err (!%p2721_p8)
}
0x179a   : > { %s2725_s13 = scalar_lea.hbm %s3464_s23, 256  ;;  %s2729_s22 = scalar_lea.hbm %s3549_s7, 512 }
0x179b   : > { %p2726_p4 = scmp.ne.s32.totalorder %s3464_s23, %s2725_s13  ;;  %p2730_p0 = scmp.lt.u32.totalorder %s3464_s23, %s3549_s7 }
0x179c   : > { %p2731_p5 = scmp.lt.u32.totalorder %s2729_s22, %s2725_s13  ;;  %p2733_p6 = scmp.lt.u32.totalorder %s2725_s13, %s3464_s23 }
0x179d   : > { %p2727_p10 = pnand %p2726_p4, %p3574_p9 }
0x179e   : > { %p2732_p7 = por %p2731_p5, %p2730_p0 }
0x179f   : > { %p2728_p11 = pneg %p2727_p10 }
0x17a0   : > { %p2734_p12 = por %p2733_p6, %p2732_p7 }
0x17a2   : > { %p2735_p13 = pnand %p2734_p12, %p2728_p11 }
0x17a4   : > { %2738 = shalt.err (!%p2735_p13)
}
0x17a5   : > { %s2838_s17 = smov 128   ;;  %s2839_s11 = smov 8  }
0x17a6   : > { %2320 = dma.vmem_to_hbm [thread:$0]  (%p3574_p9), %s3466_s21, 256, %s3464_s23, %s1789_s1, %s2838_s17, %s2838_s17, %s2839_s11  }
0x17a7   : > { %s1794_s19 = scalar_lea.sflag [#allocation16], %s3155_s25  ;;  %s2739_s18 = scalar_lea.vmem %s3459_s20, 32 }
0x17a8   : > { %p2740_p1 = scmp.ne.s32.totalorder %s3459_s20, %s2739_s18  ;;  %s2840_s13 = smov [#allocation15]  }
0x17a9   : > { %s2743_s26 = sshll.u32 %s2840_s13, 4  ;;  %s2744_s26 = int_to_ptr.vmem [resolvable:$false] %s2743_s26 }
0x17aa   : > { %p2741_p3 = pnand %p2740_p1, %p3574_p9  ;;  %s2745_s22 = scalar_lea.vmem %s2744_s26, 64 }
0x17ab   : > { %p2746_p8 = scmp.lt.s32.totalorder %s3459_s20, %s2744_s26  ;;  %p2747_p4 = scmp.lt.s32.totalorder %s2745_s22, %s2739_s18 }
0x17ac   : > { %p2742_p2 = pneg %p2741_p3 }
0x17ad   : > { %p2748_p10 = por %p2747_p4, %p2746_p8 }
0x17af   : > { %p2749_p11 = pnand %p2748_p10, %p2742_p2 }
0x17b1   : > { %2752 = shalt.err (!%p2749_p11)
}
0x17b2   : > { %s2753_s21 = scalar_lea.hbm %s3473_s9, 32  ;;  %s2757_s12 = scalar_lea.hbm %s3550_s8, 64 }
0x17b3   : > { %p2754_p0 = scmp.ne.s32.totalorder %s3473_s9, %s2753_s21  ;;  %p2758_p6 = scmp.lt.u32.totalorder %s3473_s9, %s3550_s8 }
0x17b4   : > { %p2759_p12 = scmp.lt.u32.totalorder %s2757_s12, %s2753_s21  ;;  %p2761_p1 = scmp.lt.u32.totalorder %s2753_s21, %s3473_s9 }
0x17b5   : > { %p2755_p5 = pnand %p2754_p0, %p3574_p9 }
0x17b6   : > { %p2760_p13 = por %p2759_p12, %p2758_p6 }
0x17b7   : > { %p2756_p7 = pneg %p2755_p5 }
0x17b8   : > { %p2762_p3 = por %p2761_p1, %p2760_p13 }
0x17ba   : > { %p2763_p2 = pnand %p2762_p3, %p2756_p7 }
0x17bc   : > { %2766 = shalt.err (!%p2763_p2)
}
0x17bd   : > { %s2841_s11 = smov 16   ;;  %s2842_s18 = smov 1  }
0x17be   : > { %2321 = dma.vmem_to_hbm [thread:$0]  (%p3574_p9), %s3459_s20, 32, %s3473_s9, %s1794_s19, %s2841_s11, %s2841_s11, %s2842_s18  }
0x17bf PF: > { %s1838_s13 = sand.u32 1, %s2809_s27   ;;  %p3575_p8 = scmp.ne.s32.totalorder %s3564_s10, 0 }
0x17c0   : > { %p3576_p4 = scmp.ge.s32.totalorder %s2821_s30, 2  ;;  %s1839_s26 = scalar_lea.sflag [#allocation4], %s1838_s13 }
0x17c2   : > { %p2348_p10 = pnand %p3576_p4, %p3575_p8 }
0x17c4   : > { %2800 = dma.done.wait (!%p2348_p10), %s1839_s26, 256  }
0x17c5   : > { %2802 = vsyncadd (!%p2348_p10), %s1839_s26, 4294967040  ;;  %s1848_s22 = scalar_lea.sflag [#allocation16], %s1838_s13 }
0x17c6   : > { %2804 = dma.done.wait (!%p2348_p10), %s1848_s22, 32  }
0x17c7   : > { %2806 = vsyncadd (!%p2348_p10), %s1848_s22, 4294967264  ;;  %p28_p9 = scmp.ge.s32.totalorder %s3073_s15, 4   ;;  %s3577_s27 = smov %s2813_s28 }
0x17c8   : > { %s3578_s28 = smov %s2817_s29  ;;  %s3579_s29 = smov %s3084_s24 }
0x17c9   : > { %s3580_s30 = smov %s3073_s15  ;;  %30 = sbr.rel (!%p28_p9) target bundleno = 12 (0xc), region = 134 }
0x17d0   :  { %1853 = vsyncpa [#allocation3], 1 }
0x17d1   :  { %1855 = vsyncpa [#allocation3 + $0x1], 1 }
0x17d2   :  { %1856 = vsyncpa [#allocation6], 1 }
0x17d3   :  { %1857 = vsyncpa [#allocation9], 1 }
0x17d4   :  { %1858 = vsyncpa [#allocation12], 1 }
0x17d5   :  { %1859 = vsyncpa [#allocation4], 1 }
0x17d6   :  { %1861 = vsyncpa [#allocation4 + $0x1], 1 }
0x17d7   :  { %1862 = vsyncpa [#allocation16], 1 }
0x17d8   :  { %1864 = vsyncpa [#allocation16 + $0x1], 1 }

</bundles_post_ra>
